<compile_context>
chip_gen: v7x
topology: tpu7x:2x2x1
jax: 0.10.0
libtpu: 0.0.40
codegen_flags: <defaults>
</compile_context>

<pallas_src>
import jax
import jax.numpy as jnp
from jax.experimental import pallas as pl
from jax.experimental.pallas import tpu as pltpu

B, T, E = 2, 8, 32          # batch, pad_size, embedding_dim
H = 16                      # dis_rnn_hidden_size
C = 4                       # num_class
LAYERS = 1                  # dis_rnn_lstm_layers
OUT_PAD = 128               # lane-dense padded logits width

_HI = jax.lax.Precision.HIGHEST


def _dot(a, b):
    return jnp.dot(a, b, precision=_HI, preferred_element_type=jnp.float32)


def _lstm_step(xproj_t, h, c, whh):
    """One LSTM step; the input projection (incl. bias) is precomputed."""
    gates = xproj_t + _dot(h, whh)                 # (B, 4H); PyTorch order i,f,g,o
    sig = jax.nn.sigmoid(gates)                    # full-vreg EUP, slice afterwards
    tnh = jnp.tanh(gates)
    i = sig[:, 0 * H:1 * H]
    f = sig[:, 1 * H:2 * H]
    g = tnh[:, 2 * H:3 * H]
    o = sig[:, 3 * H:4 * H]
    c_new = f * c + i * g
    h_new = o * jnp.tanh(c_new)
    return h_new, c_new


def disc_kernel(emb_ref, watt_ref,
                wih_a_f_ref, wih_e_f_ref, whh_f_ref, b_f_ref,
                wih_a_b_ref, wih_e_b_ref, whh_b_ref, b_b_ref,
                h0_ref, c0_ref,
                fcw_f_ref, fcw_b_ref, fcb_ref,
                out_ref):
    x = emb_ref[...]                                     # (B, T, E)
    x_flat = x.reshape(B * T, E)

    # ---- Attention: alpha = softmax(tanh(x) @ w, dim=1); x_att = x * alpha ----
    scores = _dot(jnp.tanh(x_flat), watt_ref[...]).reshape(B, T, 1)
    scores = scores - jnp.max(scores, axis=1, keepdims=True)
    p = jnp.exp(scores)
    alpha = p / jnp.sum(p, axis=1, keepdims=True)        # softmax over seq axis
    x_att = x * alpha                                    # (B, T, E)
    x_att_flat = x_att.reshape(B * T, E)

    # ---- Hoisted input-to-hidden projection, forward direction, all T steps ----
    # = concat([x_att, x], -1) @ W_ih_f.T + (b_ih_f + b_hh_f)
    xproj_f = (_dot(x_att_flat, wih_a_f_ref[...])
               + _dot(x_flat, wih_e_f_ref[...])
               + b_f_ref[...]).reshape(B, T, 4 * H)

    # ---- Reverse direction: fc(out[:, -1, :]) only consumes the backward
    # hidden state after its *first* step (input x[:, T-1]).  Computed before
    # the serial forward chain so its latency hides under it. ----
    xproj_b = (_dot(x_att[:, T - 1, :], wih_a_b_ref[...])
               + _dot(x[:, T - 1, :], wih_e_b_ref[...])
               + b_b_ref[...])
    h_b, _ = _lstm_step(xproj_b, h0_ref[1], c0_ref[1], whh_b_ref[...])
    logits = _dot(h_b, fcw_b_ref[...]) + fcb_ref[...]    # (B, OUT_PAD)

    # ---- Forward recurrence: only h @ W_hh remains inside the serial loop ----
    h_f = h0_ref[0]                                      # (B, H)
    c_f = c0_ref[0]
    whh_f = whh_f_ref[...]
    for t in range(T):
        h_f, c_f = _lstm_step(xproj_f[:, t, :], h_f, c_f, whh_f)

    # Lane-dense (B, 128) store; wrapper slices back to (B, C).
    out_ref[...] = logits + _dot(h_f, fcw_f_ref[...])


def discriminator_forward(emb, params, h0, c0):
    args = (emb, params["w_att"],
            params["wih_a_f"], params["wih_e_f"], params["whh_f"], params["b_f"],
            params["wih_a_b"], params["wih_e_b"], params["whh_b"], params["b_b"],
            h0, c0,
            params["fcw_f"], params["fcw_b"], params["fcb"])
    vmem = pl.BlockSpec(memory_space=pltpu.MemorySpace.VMEM)
    out = pl.pallas_call(
        disc_kernel,
        out_shape=jax.ShapeDtypeStruct((B, OUT_PAD), jnp.float32),
        in_specs=[vmem] * len(args),
        out_specs=vmem,
    )(*args)
    return out[:, :C]


def ref_forward(emb, w_att_vec, wih_f, whh_f, bih_f, bhh_f,
                wih_b, whh_b, bih_b, bhh_b, fc_w, fc_b, h0, c0):
    """Plain-JAX reference matching the PyTorch module (full bidirectional pass)."""
    dot = lambda a, b: jnp.dot(a, b, precision=_HI,
                               preferred_element_type=jnp.float32)
    m = jnp.tanh(emb)
    scores = dot(m, w_att_vec.reshape(E, 1))[..., 0]     # (B, T)
    alpha = jax.nn.softmax(scores, axis=1)[..., None]
    x = jnp.concatenate([emb * alpha, emb], axis=-1)     # (B, T, 2E)

    def cell(xt, h, c, wih, whh, b):
        g = dot(xt, wih.T) + dot(h, whh.T) + b
        i, f, gg, o = jnp.split(g, 4, axis=-1)
        c = jax.nn.sigmoid(f) * c + jax.nn.sigmoid(i) * jnp.tanh(gg)
        h = jax.nn.sigmoid(o) * jnp.tanh(c)
        return h, c

    hf, cf = h0[0], c0[0]
    for t in range(T):
        hf, cf = cell(x[:, t], hf, cf, wih_f, whh_f, bih_f + bhh_f)
    hb, cb = h0[1], c0[1]
    outs_b = [None] * T
    for t in range(T - 1, -1, -1):
        hb, cb = cell(x[:, t], hb, cb, wih_b, whh_b, bih_b + bhh_b)
        outs_b[t] = hb
    out_last = jnp.concatenate([hf, outs_b[-1]], axis=-1)
    return dot(out_last, fc_w.T) + fc_b


if __name__ == "__main__":
    key = jax.random.PRNGKey(0)
    ks = jax.random.split(key, 16)
    f32 = jnp.float32

    emb = jax.random.normal(ks[0], (B, T, E), f32)
    w_att = 0.05 * jax.random.normal(ks[1], (E,), f32)        # Attention.w ~ N(0, 0.05)

    k = 1.0 / float(H) ** 0.5
    u = lambda kk, shape: jax.random.uniform(kk, shape, f32, -k, k)
    # PyTorch LSTM parameter layout: W_ih (4H, 2E), W_hh (4H, H), biases (4H,)
    wih_f, whh_f = u(ks[2], (4 * H, 2 * E)), u(ks[3], (4 * H, H))
    bih_f, bhh_f = u(ks[4], (4 * H,)), u(ks[5], (4 * H,))
    wih_b, whh_b = u(ks[6], (4 * H, 2 * E)), u(ks[7], (4 * H, H))
    bih_b, bhh_b = u(ks[8], (4 * H,)), u(ks[9], (4 * H,))
    fc_w, fc_b = u(ks[10], (C, 2 * H)), u(ks[11], (C,))
    # torch.randn initial states (state=None branch of forward)
    h0 = jax.random.normal(ks[12], (2 * LAYERS, B, H), f32)
    c0 = jax.random.normal(ks[13], (2 * LAYERS, B, H), f32)

    # Zero-pad the fc projection to a lane-dense OUT_PAD-wide output slab.
    fcw_f_pad = jnp.zeros((H, OUT_PAD), f32).at[:, :C].set(fc_w[:, :H].T)
    fcw_b_pad = jnp.zeros((H, OUT_PAD), f32).at[:, :C].set(fc_w[:, H:].T)
    fcb_pad = jnp.zeros((1, OUT_PAD), f32).at[:, :C].set(fc_b)

    params = dict(
        w_att=w_att.reshape(E, 1),
        wih_a_f=wih_f[:, :E].T, wih_e_f=wih_f[:, E:].T, whh_f=whh_f.T,
        b_f=(bih_f + bhh_f).reshape(1, 4 * H),
        wih_a_b=wih_b[:, :E].T, wih_e_b=wih_b[:, E:].T, whh_b=whh_b.T,
        b_b=(bih_b + bhh_b).reshape(1, 4 * H),
        fcw_f=fcw_f_pad, fcw_b=fcw_b_pad, fcb=fcb_pad,
    )

    out = discriminator_forward(emb, params, h0, c0)
    out = jax.block_until_ready(out)

    ref = ref_forward(emb, w_att, wih_f, whh_f, bih_f, bhh_f,
                      wih_b, whh_b, bih_b, bhh_b, fc_w, fc_b, h0, c0)
    if not jnp.allclose(out, ref, atol=1e-4, rtol=1e-4):
        raise AssertionError(f"kernel/ref mismatch:\n{out}\n{ref}")

    print("KERNEL_OK")
</pallas_src>

<mosaic_0001>
module attributes {stable_mosaic.version = 11 : i64} {
  func.func @disc_kernel(%arg0: memref<2x8x32xf32, #tpu.memory_space<vmem>>, %arg1: memref<32x1xf32, #tpu.memory_space<vmem>>, %arg2: memref<32x64xf32, #tpu.memory_space<vmem>>, %arg3: memref<32x64xf32, #tpu.memory_space<vmem>>, %arg4: memref<16x64xf32, #tpu.memory_space<vmem>>, %arg5: memref<1x64xf32, #tpu.memory_space<vmem>>, %arg6: memref<32x64xf32, #tpu.memory_space<vmem>>, %arg7: memref<32x64xf32, #tpu.memory_space<vmem>>, %arg8: memref<16x64xf32, #tpu.memory_space<vmem>>, %arg9: memref<1x64xf32, #tpu.memory_space<vmem>>, %arg10: memref<2x2x16xf32, #tpu.memory_space<vmem>>, %arg11: memref<2x2x16xf32, #tpu.memory_space<vmem>>, %arg12: memref<16x128xf32, #tpu.memory_space<vmem>>, %arg13: memref<16x128xf32, #tpu.memory_space<vmem>>, %arg14: memref<1x128xf32, #tpu.memory_space<vmem>>, %arg15: memref<2x128xf32, #tpu.memory_space<vmem>>) attributes {dimension_semantics = [], scalar_prefetch = 0 : i64, scratch_operands = 0 : i64, tpu.core_type = #tpu.core_type<tc>} {
    %c0 = arith.constant 0 : index
    %c0_0 = arith.constant 0 : index
    %c0_1 = arith.constant 0 : index
    %0 = vector.load %arg0[%c0, %c0_0, %c0_1] : memref<2x8x32xf32, #tpu.memory_space<vmem>>, vector<2x8x32xf32>
    %1 = vector.shape_cast %0 : vector<2x8x32xf32> to vector<16x32xf32>
    %2 = math.tanh %1 : vector<16x32xf32>
    %c0_2 = arith.constant 0 : index
    %c0_3 = arith.constant 0 : index
    %3 = vector.load %arg1[%c0_2, %c0_3] : memref<32x1xf32, #tpu.memory_space<vmem>>, vector<32x1xf32>
    %cst = arith.constant dense<0.000000e+00> : vector<16x1xf32>
    %4 = tpu.matmul %2, %3, %cst {dimension_numbers = #tpu.dot_dimension_numbers<[1], [0], [0], [1], [0, 0, 1, 1], [], []>, precision = #tpu.contract_precision<fp32>} : vector<16x32xf32>, vector<32x1xf32>, vector<16x1xf32> -> vector<16x1xf32>
    %5 = vector.shape_cast %4 : vector<16x1xf32> to vector<2x8x1xf32>
    %cst_4 = arith.constant dense<0xFF800000> : vector<2x1xf32>
    %6 = vector.multi_reduction <maximumf>, %5, %cst_4 [1] : vector<2x8x1xf32> to vector<2x1xf32>
    %7 = vector.shape_cast %6 : vector<2x1xf32> to vector<2x1x1xf32>
    %8 = vector.broadcast %7 : vector<2x1x1xf32> to vector<2x8x1xf32>
    %9 = arith.subf %5, %8 : vector<2x8x1xf32>
    %10 = math.exp %9 : vector<2x8x1xf32>
    %cst_5 = arith.constant dense<0.000000e+00> : vector<2x1xf32>
    %11 = vector.multi_reduction <add>, %10, %cst_5 [1] : vector<2x8x1xf32> to vector<2x1xf32>
    %12 = vector.shape_cast %11 : vector<2x1xf32> to vector<2x1x1xf32>
    %13 = vector.broadcast %12 : vector<2x1x1xf32> to vector<2x8x1xf32>
    %14 = arith.divf %10, %13 : vector<2x8x1xf32>
    %15 = vector.broadcast %14 : vector<2x8x1xf32> to vector<2x8x32xf32>
    %16 = arith.mulf %0, %15 : vector<2x8x32xf32>
    %17 = vector.shape_cast %16 : vector<2x8x32xf32> to vector<16x32xf32>
    %c0_6 = arith.constant 0 : index
    %c0_7 = arith.constant 0 : index
    %18 = vector.load %arg2[%c0_6, %c0_7] : memref<32x64xf32, #tpu.memory_space<vmem>>, vector<32x64xf32>
    %cst_8 = arith.constant dense<0.000000e+00> : vector<16x64xf32>
    %19 = tpu.matmul %17, %18, %cst_8 {dimension_numbers = #tpu.dot_dimension_numbers<[1], [0], [0], [1], [0, 0, 1, 1], [], []>, precision = #tpu.contract_precision<fp32>} : vector<16x32xf32>, vector<32x64xf32>, vector<16x64xf32> -> vector<16x64xf32>
    %c0_9 = arith.constant 0 : index
    %c0_10 = arith.constant 0 : index
    %20 = vector.load %arg3[%c0_9, %c0_10] : memref<32x64xf32, #tpu.memory_space<vmem>>, vector<32x64xf32>
    %cst_11 = arith.constant dense<0.000000e+00> : vector<16x64xf32>
    %21 = tpu.matmul %1, %20, %cst_11 {dimension_numbers = #tpu.dot_dimension_numbers<[1], [0], [0], [1], [0, 0, 1, 1], [], []>, precision = #tpu.contract_precision<fp32>} : vector<16x32xf32>, vector<32x64xf32>, vector<16x64xf32> -> vector<16x64xf32>
    %22 = arith.addf %19, %21 : vector<16x64xf32>
    %c0_12 = arith.constant 0 : index
    %c0_13 = arith.constant 0 : index
    %23 = vector.load %arg5[%c0_12, %c0_13] : memref<1x64xf32, #tpu.memory_space<vmem>>, vector<1x64xf32>
    %24 = vector.broadcast %23 : vector<1x64xf32> to vector<16x64xf32>
    %25 = arith.addf %22, %24 : vector<16x64xf32>
    %26 = vector.shape_cast %25 : vector<16x64xf32> to vector<2x8x64xf32>
    %27 = vector.extract_strided_slice %16 {offsets = [0, 7, 0], sizes = [2, 1, 32], strides = [1, 1, 1]} : vector<2x8x32xf32> to vector<2x1x32xf32>
    %28 = vector.shape_cast %27 : vector<2x1x32xf32> to vector<2x32xf32>
    %c0_14 = arith.constant 0 : index
    %c0_15 = arith.constant 0 : index
    %29 = vector.load %arg6[%c0_14, %c0_15] : memref<32x64xf32, #tpu.memory_space<vmem>>, vector<32x64xf32>
    %cst_16 = arith.constant dense<0.000000e+00> : vector<2x64xf32>
    %30 = tpu.matmul %28, %29, %cst_16 {dimension_numbers = #tpu.dot_dimension_numbers<[1], [0], [0], [1], [0, 0, 1, 1], [], []>, precision = #tpu.contract_precision<fp32>} : vector<2x32xf32>, vector<32x64xf32>, vector<2x64xf32> -> vector<2x64xf32>
    %31 = vector.extract_strided_slice %0 {offsets = [0, 7, 0], sizes = [2, 1, 32], strides = [1, 1, 1]} : vector<2x8x32xf32> to vector<2x1x32xf32>
    %32 = vector.shape_cast %31 : vector<2x1x32xf32> to vector<2x32xf32>
    %c0_17 = arith.constant 0 : index
    %c0_18 = arith.constant 0 : index
    %33 = vector.load %arg7[%c0_17, %c0_18] : memref<32x64xf32, #tpu.memory_space<vmem>>, vector<32x64xf32>
    %cst_19 = arith.constant dense<0.000000e+00> : vector<2x64xf32>
    %34 = tpu.matmul %32, %33, %cst_19 {dimension_numbers = #tpu.dot_dimension_numbers<[1], [0], [0], [1], [0, 0, 1, 1], [], []>, precision = #tpu.contract_precision<fp32>} : vector<2x32xf32>, vector<32x64xf32>, vector<2x64xf32> -> vector<2x64xf32>
    %35 = arith.addf %30, %34 : vector<2x64xf32>
    %c0_20 = arith.constant 0 : index
    %c0_21 = arith.constant 0 : index
    %36 = vector.load %arg9[%c0_20, %c0_21] : memref<1x64xf32, #tpu.memory_space<vmem>>, vector<1x64xf32>
    %37 = vector.broadcast %36 : vector<1x64xf32> to vector<2x64xf32>
    %38 = arith.addf %35, %37 : vector<2x64xf32>
    %c1 = arith.constant 1 : index
    %c0_22 = arith.constant 0 : index
    %c0_23 = arith.constant 0 : index
    %39 = vector.load %arg10[%c1, %c0_22, %c0_23] : memref<2x2x16xf32, #tpu.memory_space<vmem>>, vector<1x2x16xf32>
    %40 = vector.shape_cast %39 : vector<1x2x16xf32> to vector<2x16xf32>
    %c1_24 = arith.constant 1 : index
    %c0_25 = arith.constant 0 : index
    %c0_26 = arith.constant 0 : index
    %41 = vector.load %arg11[%c1_24, %c0_25, %c0_26] : memref<2x2x16xf32, #tpu.memory_space<vmem>>, vector<1x2x16xf32>
    %42 = vector.shape_cast %41 : vector<1x2x16xf32> to vector<2x16xf32>
    %c0_27 = arith.constant 0 : index
    %c0_28 = arith.constant 0 : index
    %43 = vector.load %arg8[%c0_27, %c0_28] : memref<16x64xf32, #tpu.memory_space<vmem>>, vector<16x64xf32>
    %cst_29 = arith.constant dense<0.000000e+00> : vector<2x64xf32>
    %44 = tpu.matmul %40, %43, %cst_29 {dimension_numbers = #tpu.dot_dimension_numbers<[1], [0], [0], [1], [0, 0, 1, 1], [], []>, precision = #tpu.contract_precision<fp32>} : vector<2x16xf32>, vector<16x64xf32>, vector<2x64xf32> -> vector<2x64xf32>
    %45 = arith.addf %38, %44 : vector<2x64xf32>
    %46 = arith.negf %45 : vector<2x64xf32>
    %47 = math.exp %46 : vector<2x64xf32>
    %cst_30 = arith.constant 1.000000e+00 : f32
    %48 = vector.broadcast %cst_30 : f32 to vector<2x64xf32>
    %49 = arith.addf %48, %47 : vector<2x64xf32>
    %50 = arith.divf %48, %49 : vector<2x64xf32>
    %51 = math.tanh %45 : vector<2x64xf32>
    %52 = vector.extract_strided_slice %50 {offsets = [0, 0], sizes = [2, 16], strides = [1, 1]} : vector<2x64xf32> to vector<2x16xf32>
    %53 = vector.extract_strided_slice %50 {offsets = [0, 16], sizes = [2, 16], strides = [1, 1]} : vector<2x64xf32> to vector<2x16xf32>
    %54 = vector.extract_strided_slice %51 {offsets = [0, 32], sizes = [2, 16], strides = [1, 1]} : vector<2x64xf32> to vector<2x16xf32>
    %55 = vector.extract_strided_slice %50 {offsets = [0, 48], sizes = [2, 16], strides = [1, 1]} : vector<2x64xf32> to vector<2x16xf32>
    %56 = arith.mulf %53, %42 : vector<2x16xf32>
    %57 = arith.mulf %52, %54 : vector<2x16xf32>
    %58 = arith.addf %56, %57 : vector<2x16xf32>
    %59 = math.tanh %58 : vector<2x16xf32>
    %60 = arith.mulf %55, %59 : vector<2x16xf32>
    %c0_31 = arith.constant 0 : index
    %c0_32 = arith.constant 0 : index
    %61 = vector.load %arg13[%c0_31, %c0_32] : memref<16x128xf32, #tpu.memory_space<vmem>>, vector<16x128xf32>
    %cst_33 = arith.constant dense<0.000000e+00> : vector<2x128xf32>
    %62 = tpu.matmul %60, %61, %cst_33 {dimension_numbers = #tpu.dot_dimension_numbers<[1], [0], [0], [1], [0, 0, 1, 1], [], []>, precision = #tpu.contract_precision<fp32>} : vector<2x16xf32>, vector<16x128xf32>, vector<2x128xf32> -> vector<2x128xf32>
    %c0_34 = arith.constant 0 : index
    %c0_35 = arith.constant 0 : index
    %63 = vector.load %arg14[%c0_34, %c0_35] : memref<1x128xf32, #tpu.memory_space<vmem>>, vector<1x128xf32>
    %64 = vector.broadcast %63 : vector<1x128xf32> to vector<2x128xf32>
    %65 = arith.addf %62, %64 : vector<2x128xf32>
    %c0_36 = arith.constant 0 : index
    %c0_37 = arith.constant 0 : index
    %c0_38 = arith.constant 0 : index
    %66 = vector.load %arg10[%c0_36, %c0_37, %c0_38] : memref<2x2x16xf32, #tpu.memory_space<vmem>>, vector<1x2x16xf32>
    %67 = vector.shape_cast %66 : vector<1x2x16xf32> to vector<2x16xf32>
    %c0_39 = arith.constant 0 : index
    %c0_40 = arith.constant 0 : index
    %c0_41 = arith.constant 0 : index
    %68 = vector.load %arg11[%c0_39, %c0_40, %c0_41] : memref<2x2x16xf32, #tpu.memory_space<vmem>>, vector<1x2x16xf32>
    %69 = vector.shape_cast %68 : vector<1x2x16xf32> to vector<2x16xf32>
    %c0_42 = arith.constant 0 : index
    %c0_43 = arith.constant 0 : index
    %70 = vector.load %arg4[%c0_42, %c0_43] : memref<16x64xf32, #tpu.memory_space<vmem>>, vector<16x64xf32>
    %71 = vector.extract_strided_slice %26 {offsets = [0, 0, 0], sizes = [2, 1, 64], strides = [1, 1, 1]} : vector<2x8x64xf32> to vector<2x1x64xf32>
    %72 = vector.shape_cast %71 : vector<2x1x64xf32> to vector<2x64xf32>
    %cst_44 = arith.constant dense<0.000000e+00> : vector<2x64xf32>
    %73 = tpu.matmul %67, %70, %cst_44 {dimension_numbers = #tpu.dot_dimension_numbers<[1], [0], [0], [1], [0, 0, 1, 1], [], []>, precision = #tpu.contract_precision<fp32>} : vector<2x16xf32>, vector<16x64xf32>, vector<2x64xf32> -> vector<2x64xf32>
    %74 = arith.addf %72, %73 : vector<2x64xf32>
    %75 = arith.negf %74 : vector<2x64xf32>
    %76 = math.exp %75 : vector<2x64xf32>
    %cst_45 = arith.constant 1.000000e+00 : f32
    %77 = vector.broadcast %cst_45 : f32 to vector<2x64xf32>
    %78 = arith.addf %77, %76 : vector<2x64xf32>
    %79 = arith.divf %77, %78 : vector<2x64xf32>
    %80 = math.tanh %74 : vector<2x64xf32>
    %81 = vector.extract_strided_slice %79 {offsets = [0, 0], sizes = [2, 16], strides = [1, 1]} : vector<2x64xf32> to vector<2x16xf32>
    %82 = vector.extract_strided_slice %79 {offsets = [0, 16], sizes = [2, 16], strides = [1, 1]} : vector<2x64xf32> to vector<2x16xf32>
    %83 = vector.extract_strided_slice %80 {offsets = [0, 32], sizes = [2, 16], strides = [1, 1]} : vector<2x64xf32> to vector<2x16xf32>
    %84 = vector.extract_strided_slice %79 {offsets = [0, 48], sizes = [2, 16], strides = [1, 1]} : vector<2x64xf32> to vector<2x16xf32>
    %85 = arith.mulf %82, %69 : vector<2x16xf32>
    %86 = arith.mulf %81, %83 : vector<2x16xf32>
    %87 = arith.addf %85, %86 : vector<2x16xf32>
    %88 = math.tanh %87 : vector<2x16xf32>
    %89 = arith.mulf %84, %88 : vector<2x16xf32>
    %90 = vector.extract_strided_slice %26 {offsets = [0, 1, 0], sizes = [2, 1, 64], strides = [1, 1, 1]} : vector<2x8x64xf32> to vector<2x1x64xf32>
    %91 = vector.shape_cast %90 : vector<2x1x64xf32> to vector<2x64xf32>
    %cst_46 = arith.constant dense<0.000000e+00> : vector<2x64xf32>
    %92 = tpu.matmul %89, %70, %cst_46 {dimension_numbers = #tpu.dot_dimension_numbers<[1], [0], [0], [1], [0, 0, 1, 1], [], []>, precision = #tpu.contract_precision<fp32>} : vector<2x16xf32>, vector<16x64xf32>, vector<2x64xf32> -> vector<2x64xf32>
    %93 = arith.addf %91, %92 : vector<2x64xf32>
    %94 = arith.negf %93 : vector<2x64xf32>
    %95 = math.exp %94 : vector<2x64xf32>
    %cst_47 = arith.constant 1.000000e+00 : f32
    %96 = vector.broadcast %cst_47 : f32 to vector<2x64xf32>
    %97 = arith.addf %96, %95 : vector<2x64xf32>
    %98 = arith.divf %96, %97 : vector<2x64xf32>
    %99 = math.tanh %93 : vector<2x64xf32>
    %100 = vector.extract_strided_slice %98 {offsets = [0, 0], sizes = [2, 16], strides = [1, 1]} : vector<2x64xf32> to vector<2x16xf32>
    %101 = vector.extract_strided_slice %98 {offsets = [0, 16], sizes = [2, 16], strides = [1, 1]} : vector<2x64xf32> to vector<2x16xf32>
    %102 = vector.extract_strided_slice %99 {offsets = [0, 32], sizes = [2, 16], strides = [1, 1]} : vector<2x64xf32> to vector<2x16xf32>
    %103 = vector.extract_strided_slice %98 {offsets = [0, 48], sizes = [2, 16], strides = [1, 1]} : vector<2x64xf32> to vector<2x16xf32>
    %104 = arith.mulf %101, %87 : vector<2x16xf32>
    %105 = arith.mulf %100, %102 : vector<2x16xf32>
    %106 = arith.addf %104, %105 : vector<2x16xf32>
    %107 = math.tanh %106 : vector<2x16xf32>
    %108 = arith.mulf %103, %107 : vector<2x16xf32>
    %109 = vector.extract_strided_slice %26 {offsets = [0, 2, 0], sizes = [2, 1, 64], strides = [1, 1, 1]} : vector<2x8x64xf32> to vector<2x1x64xf32>
    %110 = vector.shape_cast %109 : vector<2x1x64xf32> to vector<2x64xf32>
    %cst_48 = arith.constant dense<0.000000e+00> : vector<2x64xf32>
    %111 = tpu.matmul %108, %70, %cst_48 {dimension_numbers = #tpu.dot_dimension_numbers<[1], [0], [0], [1], [0, 0, 1, 1], [], []>, precision = #tpu.contract_precision<fp32>} : vector<2x16xf32>, vector<16x64xf32>, vector<2x64xf32> -> vector<2x64xf32>
    %112 = arith.addf %110, %111 : vector<2x64xf32>
    %113 = arith.negf %112 : vector<2x64xf32>
    %114 = math.exp %113 : vector<2x64xf32>
    %cst_49 = arith.constant 1.000000e+00 : f32
    %115 = vector.broadcast %cst_49 : f32 to vector<2x64xf32>
    %116 = arith.addf %115, %114 : vector<2x64xf32>
    %117 = arith.divf %115, %116 : vector<2x64xf32>
    %118 = math.tanh %112 : vector<2x64xf32>
    %119 = vector.extract_strided_slice %117 {offsets = [0, 0], sizes = [2, 16], strides = [1, 1]} : vector<2x64xf32> to vector<2x16xf32>
    %120 = vector.extract_strided_slice %117 {offsets = [0, 16], sizes = [2, 16], strides = [1, 1]} : vector<2x64xf32> to vector<2x16xf32>
    %121 = vector.extract_strided_slice %118 {offsets = [0, 32], sizes = [2, 16], strides = [1, 1]} : vector<2x64xf32> to vector<2x16xf32>
    %122 = vector.extract_strided_slice %117 {offsets = [0, 48], sizes = [2, 16], strides = [1, 1]} : vector<2x64xf32> to vector<2x16xf32>
    %123 = arith.mulf %120, %106 : vector<2x16xf32>
    %124 = arith.mulf %119, %121 : vector<2x16xf32>
    %125 = arith.addf %123, %124 : vector<2x16xf32>
    %126 = math.tanh %125 : vector<2x16xf32>
    %127 = arith.mulf %122, %126 : vector<2x16xf32>
    %128 = vector.extract_strided_slice %26 {offsets = [0, 3, 0], sizes = [2, 1, 64], strides = [1, 1, 1]} : vector<2x8x64xf32> to vector<2x1x64xf32>
    %129 = vector.shape_cast %128 : vector<2x1x64xf32> to vector<2x64xf32>
    %cst_50 = arith.constant dense<0.000000e+00> : vector<2x64xf32>
    %130 = tpu.matmul %127, %70, %cst_50 {dimension_numbers = #tpu.dot_dimension_numbers<[1], [0], [0], [1], [0, 0, 1, 1], [], []>, precision = #tpu.contract_precision<fp32>} : vector<2x16xf32>, vector<16x64xf32>, vector<2x64xf32> -> vector<2x64xf32>
    %131 = arith.addf %129, %130 : vector<2x64xf32>
    %132 = arith.negf %131 : vector<2x64xf32>
    %133 = math.exp %132 : vector<2x64xf32>
    %cst_51 = arith.constant 1.000000e+00 : f32
    %134 = vector.broadcast %cst_51 : f32 to vector<2x64xf32>
    %135 = arith.addf %134, %133 : vector<2x64xf32>
    %136 = arith.divf %134, %135 : vector<2x64xf32>
    %137 = math.tanh %131 : vector<2x64xf32>
    %138 = vector.extract_strided_slice %136 {offsets = [0, 0], sizes = [2, 16], strides = [1, 1]} : vector<2x64xf32> to vector<2x16xf32>
    %139 = vector.extract_strided_slice %136 {offsets = [0, 16], sizes = [2, 16], strides = [1, 1]} : vector<2x64xf32> to vector<2x16xf32>
    %140 = vector.extract_strided_slice %137 {offsets = [0, 32], sizes = [2, 16], strides = [1, 1]} : vector<2x64xf32> to vector<2x16xf32>
    %141 = vector.extract_strided_slice %136 {offsets = [0, 48], sizes = [2, 16], strides = [1, 1]} : vector<2x64xf32> to vector<2x16xf32>
    %142 = arith.mulf %139, %125 : vector<2x16xf32>
    %143 = arith.mulf %138, %140 : vector<2x16xf32>
    %144 = arith.addf %142, %143 : vector<2x16xf32>
    %145 = math.tanh %144 : vector<2x16xf32>
    %146 = arith.mulf %141, %145 : vector<2x16xf32>
    %147 = vector.extract_strided_slice %26 {offsets = [0, 4, 0], sizes = [2, 1, 64], strides = [1, 1, 1]} : vector<2x8x64xf32> to vector<2x1x64xf32>
    %148 = vector.shape_cast %147 : vector<2x1x64xf32> to vector<2x64xf32>
    %cst_52 = arith.constant dense<0.000000e+00> : vector<2x64xf32>
    %149 = tpu.matmul %146, %70, %cst_52 {dimension_numbers = #tpu.dot_dimension_numbers<[1], [0], [0], [1], [0, 0, 1, 1], [], []>, precision = #tpu.contract_precision<fp32>} : vector<2x16xf32>, vector<16x64xf32>, vector<2x64xf32> -> vector<2x64xf32>
    %150 = arith.addf %148, %149 : vector<2x64xf32>
    %151 = arith.negf %150 : vector<2x64xf32>
    %152 = math.exp %151 : vector<2x64xf32>
    %cst_53 = arith.constant 1.000000e+00 : f32
    %153 = vector.broadcast %cst_53 : f32 to vector<2x64xf32>
    %154 = arith.addf %153, %152 : vector<2x64xf32>
    %155 = arith.divf %153, %154 : vector<2x64xf32>
    %156 = math.tanh %150 : vector<2x64xf32>
    %157 = vector.extract_strided_slice %155 {offsets = [0, 0], sizes = [2, 16], strides = [1, 1]} : vector<2x64xf32> to vector<2x16xf32>
    %158 = vector.extract_strided_slice %155 {offsets = [0, 16], sizes = [2, 16], strides = [1, 1]} : vector<2x64xf32> to vector<2x16xf32>
    %159 = vector.extract_strided_slice %156 {offsets = [0, 32], sizes = [2, 16], strides = [1, 1]} : vector<2x64xf32> to vector<2x16xf32>
    %160 = vector.extract_strided_slice %155 {offsets = [0, 48], sizes = [2, 16], strides = [1, 1]} : vector<2x64xf32> to vector<2x16xf32>
    %161 = arith.mulf %158, %144 : vector<2x16xf32>
    %162 = arith.mulf %157, %159 : vector<2x16xf32>
    %163 = arith.addf %161, %162 : vector<2x16xf32>
    %164 = math.tanh %163 : vector<2x16xf32>
    %165 = arith.mulf %160, %164 : vector<2x16xf32>
    %166 = vector.extract_strided_slice %26 {offsets = [0, 5, 0], sizes = [2, 1, 64], strides = [1, 1, 1]} : vector<2x8x64xf32> to vector<2x1x64xf32>
    %167 = vector.shape_cast %166 : vector<2x1x64xf32> to vector<2x64xf32>
    %cst_54 = arith.constant dense<0.000000e+00> : vector<2x64xf32>
    %168 = tpu.matmul %165, %70, %cst_54 {dimension_numbers = #tpu.dot_dimension_numbers<[1], [0], [0], [1], [0, 0, 1, 1], [], []>, precision = #tpu.contract_precision<fp32>} : vector<2x16xf32>, vector<16x64xf32>, vector<2x64xf32> -> vector<2x64xf32>
    %169 = arith.addf %167, %168 : vector<2x64xf32>
    %170 = arith.negf %169 : vector<2x64xf32>
    %171 = math.exp %170 : vector<2x64xf32>
    %cst_55 = arith.constant 1.000000e+00 : f32
    %172 = vector.broadcast %cst_55 : f32 to vector<2x64xf32>
    %173 = arith.addf %172, %171 : vector<2x64xf32>
    %174 = arith.divf %172, %173 : vector<2x64xf32>
    %175 = math.tanh %169 : vector<2x64xf32>
    %176 = vector.extract_strided_slice %174 {offsets = [0, 0], sizes = [2, 16], strides = [1, 1]} : vector<2x64xf32> to vector<2x16xf32>
    %177 = vector.extract_strided_slice %174 {offsets = [0, 16], sizes = [2, 16], strides = [1, 1]} : vector<2x64xf32> to vector<2x16xf32>
    %178 = vector.extract_strided_slice %175 {offsets = [0, 32], sizes = [2, 16], strides = [1, 1]} : vector<2x64xf32> to vector<2x16xf32>
    %179 = vector.extract_strided_slice %174 {offsets = [0, 48], sizes = [2, 16], strides = [1, 1]} : vector<2x64xf32> to vector<2x16xf32>
    %180 = arith.mulf %177, %163 : vector<2x16xf32>
    %181 = arith.mulf %176, %178 : vector<2x16xf32>
    %182 = arith.addf %180, %181 : vector<2x16xf32>
    %183 = math.tanh %182 : vector<2x16xf32>
    %184 = arith.mulf %179, %183 : vector<2x16xf32>
    %185 = vector.extract_strided_slice %26 {offsets = [0, 6, 0], sizes = [2, 1, 64], strides = [1, 1, 1]} : vector<2x8x64xf32> to vector<2x1x64xf32>
    %186 = vector.shape_cast %185 : vector<2x1x64xf32> to vector<2x64xf32>
    %cst_56 = arith.constant dense<0.000000e+00> : vector<2x64xf32>
    %187 = tpu.matmul %184, %70, %cst_56 {dimension_numbers = #tpu.dot_dimension_numbers<[1], [0], [0], [1], [0, 0, 1, 1], [], []>, precision = #tpu.contract_precision<fp32>} : vector<2x16xf32>, vector<16x64xf32>, vector<2x64xf32> -> vector<2x64xf32>
    %188 = arith.addf %186, %187 : vector<2x64xf32>
    %189 = arith.negf %188 : vector<2x64xf32>
    %190 = math.exp %189 : vector<2x64xf32>
    %cst_57 = arith.constant 1.000000e+00 : f32
    %191 = vector.broadcast %cst_57 : f32 to vector<2x64xf32>
    %192 = arith.addf %191, %190 : vector<2x64xf32>
    %193 = arith.divf %191, %192 : vector<2x64xf32>
    %194 = math.tanh %188 : vector<2x64xf32>
    %195 = vector.extract_strided_slice %193 {offsets = [0, 0], sizes = [2, 16], strides = [1, 1]} : vector<2x64xf32> to vector<2x16xf32>
    %196 = vector.extract_strided_slice %193 {offsets = [0, 16], sizes = [2, 16], strides = [1, 1]} : vector<2x64xf32> to vector<2x16xf32>
    %197 = vector.extract_strided_slice %194 {offsets = [0, 32], sizes = [2, 16], strides = [1, 1]} : vector<2x64xf32> to vector<2x16xf32>
    %198 = vector.extract_strided_slice %193 {offsets = [0, 48], sizes = [2, 16], strides = [1, 1]} : vector<2x64xf32> to vector<2x16xf32>
    %199 = arith.mulf %196, %182 : vector<2x16xf32>
    %200 = arith.mulf %195, %197 : vector<2x16xf32>
    %201 = arith.addf %199, %200 : vector<2x16xf32>
    %202 = math.tanh %201 : vector<2x16xf32>
    %203 = arith.mulf %198, %202 : vector<2x16xf32>
    %204 = vector.extract_strided_slice %26 {offsets = [0, 7, 0], sizes = [2, 1, 64], strides = [1, 1, 1]} : vector<2x8x64xf32> to vector<2x1x64xf32>
    %205 = vector.shape_cast %204 : vector<2x1x64xf32> to vector<2x64xf32>
    %cst_58 = arith.constant dense<0.000000e+00> : vector<2x64xf32>
    %206 = tpu.matmul %203, %70, %cst_58 {dimension_numbers = #tpu.dot_dimension_numbers<[1], [0], [0], [1], [0, 0, 1, 1], [], []>, precision = #tpu.contract_precision<fp32>} : vector<2x16xf32>, vector<16x64xf32>, vector<2x64xf32> -> vector<2x64xf32>
    %207 = arith.addf %205, %206 : vector<2x64xf32>
    %208 = arith.negf %207 : vector<2x64xf32>
    %209 = math.exp %208 : vector<2x64xf32>
    %cst_59 = arith.constant 1.000000e+00 : f32
    %210 = vector.broadcast %cst_59 : f32 to vector<2x64xf32>
    %211 = arith.addf %210, %209 : vector<2x64xf32>
    %212 = arith.divf %210, %211 : vector<2x64xf32>
    %213 = math.tanh %207 : vector<2x64xf32>
    %214 = vector.extract_strided_slice %212 {offsets = [0, 0], sizes = [2, 16], strides = [1, 1]} : vector<2x64xf32> to vector<2x16xf32>
    %215 = vector.extract_strided_slice %212 {offsets = [0, 16], sizes = [2, 16], strides = [1, 1]} : vector<2x64xf32> to vector<2x16xf32>
    %216 = vector.extract_strided_slice %213 {offsets = [0, 32], sizes = [2, 16], strides = [1, 1]} : vector<2x64xf32> to vector<2x16xf32>
    %217 = vector.extract_strided_slice %212 {offsets = [0, 48], sizes = [2, 16], strides = [1, 1]} : vector<2x64xf32> to vector<2x16xf32>
    %218 = arith.mulf %215, %201 : vector<2x16xf32>
    %219 = arith.mulf %214, %216 : vector<2x16xf32>
    %220 = arith.addf %218, %219 : vector<2x16xf32>
    %221 = math.tanh %220 : vector<2x16xf32>
    %222 = arith.mulf %217, %221 : vector<2x16xf32>
    %c0_60 = arith.constant 0 : index
    %c0_61 = arith.constant 0 : index
    %223 = vector.load %arg12[%c0_60, %c0_61] : memref<16x128xf32, #tpu.memory_space<vmem>>, vector<16x128xf32>
    %cst_62 = arith.constant dense<0.000000e+00> : vector<2x128xf32>
    %224 = tpu.matmul %222, %223, %cst_62 {dimension_numbers = #tpu.dot_dimension_numbers<[1], [0], [0], [1], [0, 0, 1, 1], [], []>, precision = #tpu.contract_precision<fp32>} : vector<2x16xf32>, vector<16x128xf32>, vector<2x128xf32> -> vector<2x128xf32>
    %225 = arith.addf %65, %224 : vector<2x128xf32>
    %c0_63 = arith.constant 0 : index
    %c0_64 = arith.constant 0 : index
    %226 = vector.load %arg15[%c0_63, %c0_64] : memref<2x128xf32, #tpu.memory_space<vmem>>, vector<2x128xf32>
    tpu.vector_store %arg15[%c0_63, %c0_64], %225 {strides = array<i32>} : memref<2x128xf32, #tpu.memory_space<vmem>>, vector<2x128xf32>,
    return
  }
}

</mosaic_0001>

<bundles_post_ra>
// kernel: tpu_custom_call.1
= control target key start
LH: loop header
LB: loop body
LE: loop exit
PB: predicated region body
PF: predicated region fallthrough
CT: control target
= control target key end

     0   :  { %20 = vsyncpa [#allocation3], 0  ;;  %s11640_s0 = inlined_call_operand.hbm [shape: f32[2,8,32], index: 0, kind: input, shape index: {}]   ;;  %s11641_s1 = inlined_call_operand.vmem [shape: f32[32,1], index: 1, kind: input, shape index: {}]   ;;  %s11642_s2 = inlined_call_operand.vmem [shape: f32[32,64], index: 2, kind: input, shape index: {}]   ;;  %s11643_s3 = inlined_call_operand.hbm [shape: f32[32,64], index: 3, kind: input, shape index: {}]   ;;  %s11644_s4 = inlined_call_operand.vmem [shape: f32[16,64], index: 4, kind: input, shape index: {}]   ;;  %s11645_s5 = inlined_call_operand.vmem [shape: f32[1,64], index: 5, kind: input, shape index: {}]   ;;  %s11646_s6 = inlined_call_operand.hbm [shape: f32[32,64], index: 6, kind: input, shape index: {}]   ;;  %s11647_s7 = inlined_call_operand.hbm [shape: f32[32,64], index: 7, kind: input, shape index: {}]   ;;  %s11648_s8 = inlined_call_operand.hbm [shape: f32[16,64], index: 8, kind: input, shape index: {}]   ;;  %s11649_s9 = inlined_call_operand.vmem [shape: f32[1,64], index: 9, kind: input, shape index: {}]   ;;  %s11650_s10 = inlined_call_operand.hbm [shape: f32[2,2,16], index: 10, kind: input, shape index: {}]   ;;  %s11651_s11 = inlined_call_operand.hbm [shape: f32[2,2,16], index: 11, kind: input, shape index: {}]   ;;  %s11652_s12 = inlined_call_operand.vmem [shape: f32[16,128], index: 12, kind: input, shape index: {}]   ;;  %s11653_s13 = inlined_call_operand.vmem [shape: f32[16,128], index: 13, kind: input, shape index: {}]   ;;  %s11654_s14 = inlined_call_operand.vmem [shape: f32[1,128], index: 14, kind: input, shape index: {}]   ;;  %s11655_s15 = inlined_call_operand.hbm [shape: f32[2,128], index: 15, kind: output, shape index: {}]  }
   0x1   :  { %21 = vsyncpa [#allocation6], 0 }
   0x2   :  { %22 = vsyncpa [#allocation9], 0 }
   0x3   :  { %23 = vsyncpa [#allocation12], 0 }
   0x4   :  { %24 = vsyncpa [#allocation4], 0  ;;  %s10626_s18 = smov [#allocation5]   ;;  %s10627_s20 = smov [#allocation8]  }
   0x5   :  { %s46_s19 = sshll.u32 %s10626_s18, 4  ;;  %s74_s21 = sshll.u32 %s10627_s20, 4  ;;  %s47_s19 = int_to_ptr.vmem [resolvable:$true] %s46_s19  ;;  %s10725_s21 = int_to_ptr.vmem [resolvable:$true] %s74_s21 }
   0x6   :  { %s10440_s24 = scalar_lea.hbm %s11643_s3, 512 }
   0x7   :  { %p10441_p0 = scmp.ne.s32.totalorder %s11643_s3, %s10440_s24  ;;  %p10444_p1 = scmp.lt.u32.totalorder %s10440_s24, %s11643_s3 }
   0x9   :  { %p10446_p2 = pnand %p10444_p1, %p10441_p0 }
   0xb   :  { %10449 = shalt.err (!%p10446_p2)
}
   0xc   :  { %s10450_s29 = scalar_lea.vmem %s47_s19, 512  ;;  %p10455_p4 = scmp.lt.s32.totalorder %s47_s19, %s47_s19 }
   0xd   :  { %p10451_p3 = scmp.ne.s32.totalorder %s47_s19, %s10450_s29  ;;  %p10456_p5 = scmp.lt.s32.totalorder %s10450_s29, %s10450_s29 }
   0xf   :  { %p10457_p6 = por %p10456_p5, %p10455_p4 }
  0x11   :  { %p10458_p7 = pnand %p10457_p6, %p10451_p3 }
  0x13   :  { %10461 = shalt.err (!%p10458_p7)
}
  0x14   :  { %s11656_s30 = smov 128   ;;  %s10629_s16 = smov 8  }
  0x15   :  { %52 = dma.hbm_to_vmem [thread:$0]  %s11643_s3, 512, %s47_s19, [#allocation6], %s11656_s30, %s11656_s30, %s10629_s16  }
  0x16   :  { %s10462_s23 = scalar_lea.hbm %s11647_s7, 512 }
  0x17   :  { %p10463_p8 = scmp.ne.s32.totalorder %s11647_s7, %s10462_s23  ;;  %p10466_p9 = scmp.lt.u32.totalorder %s10462_s23, %s11647_s7 }
  0x19   :  { %p10468_p10 = pnand %p10466_p9, %p10463_p8 }
  0x1b   :  { %10471 = shalt.err (!%p10468_p10)
}
  0x1c   :  { %s10472_s28 = scalar_lea.vmem %s10725_s21, 512  ;;  %p10477_p12 = scmp.lt.s32.totalorder %s10725_s21, %s10725_s21 }
  0x1d   :  { %p10473_p11 = scmp.ne.s32.totalorder %s10725_s21, %s10472_s28  ;;  %p10478_p13 = scmp.lt.s32.totalorder %s10472_s28, %s10472_s28 }
  0x1f   :  { %p10479_p0 = por %p10478_p13, %p10477_p12 }
  0x21   :  { %p10480_p1 = pnand %p10479_p0, %p10473_p11 }
  0x23   :  { %10483 = shalt.err (!%p10480_p1)
}
  0x24   :  { %80 = dma.hbm_to_vmem [thread:$0]  %s11647_s7, 512, %s10725_s21, [#allocation9], %s11656_s30, %s11656_s30, %s10629_s16  }
  0x25   :  { %s10630_s29 = smov [#allocation11]   ;;  %s10484_s22 = scalar_lea.hbm %s11650_s10, 64 }
  0x26   :  { %s100_s17 = sshll.u32 %s10630_s29, 4  ;;  %p10485_p2 = scmp.ne.s32.totalorder %s11650_s10, %s10484_s22  ;;  %s101_s17 = int_to_ptr.vmem [resolvable:$true] %s100_s17 }
  0x27   :  { %p10488_p3 = scmp.lt.u32.totalorder %s10484_s22, %s11650_s10 }
  0x29   :  { %p10490_p4 = pnand %p10488_p3, %p10485_p2 }
  0x2b   :  { %10493 = shalt.err (!%p10490_p4)
}
  0x2c   :  { %s10494_s27 = scalar_lea.vmem %s101_s17, 64  ;;  %p10499_p6 = scmp.lt.s32.totalorder %s101_s17, %s101_s17 }
  0x2d   :  { %p10495_p5 = scmp.ne.s32.totalorder %s101_s17, %s10494_s27  ;;  %p10500_p7 = scmp.lt.s32.totalorder %s10494_s27, %s10494_s27 }
  0x2f   :  { %p10501_p8 = por %p10500_p7, %p10499_p6 }
  0x31   :  { %p10502_p9 = pnand %p10501_p8, %p10495_p5 }
  0x33   :  { %10505 = shalt.err (!%p10502_p9)
}
  0x34   :  { %s10631_s7 = smov 32   ;;  %s10632_s21 = smov 2  }
  0x35   :  { %106 = dma.hbm_to_vmem [thread:$0]  %s11650_s10, 64, %s101_s17, [#allocation12], %s10631_s7, %s10631_s7, %s10632_s21  }
  0x36   :  { %s10633_s19 = smov [#allocation2]   ;;  %s10634_s18 = smov [#allocation7]  }
  0x37   :  { %s30_s29 = sshll.u32 %s10633_s19, 4  ;;  %s62_s20 = sshll.u32 %s10634_s18, 4  ;;  %s31_s29 = int_to_ptr.vmem [resolvable:$true] %s30_s29  ;;  %s63_s20 = int_to_ptr.vmem [resolvable:$true] %s62_s20 }
  0x38   :  { %s10506_s24 = scalar_lea.hbm %s11640_s0, 256 }
  0x39   :  { %p10507_p10 = scmp.ne.s32.totalorder %s11640_s0, %s10506_s24  ;;  %p10510_p11 = scmp.lt.u32.totalorder %s10506_s24, %s11640_s0 }
  0x3b   :  { %p10512_p12 = pnand %p10510_p11, %p10507_p10 }
  0x3d   :  { %10515 = shalt.err (!%p10512_p12)
}
  0x3e   :  { %s10516_s10 = scalar_lea.vmem %s31_s29, 256  ;;  %p10521_p0 = scmp.lt.s32.totalorder %s31_s29, %s31_s29 }
  0x3f   :  { %p10517_p13 = scmp.ne.s32.totalorder %s31_s29, %s10516_s10  ;;  %p10522_p1 = scmp.lt.s32.totalorder %s10516_s10, %s10516_s10 }
  0x41   :  { %p10523_p2 = por %p10522_p1, %p10521_p0 }
  0x43   :  { %p10524_p3 = pnand %p10523_p2, %p10517_p13 }
  0x45   :  { %10527 = shalt.err (!%p10524_p3)
}
  0x46   :  { %s11658_s17 = smov 128   ;;  %s10528_s18 = scalar_lea.hbm %s11646_s6, 512 }
  0x47   :  { %36 = dma.hbm_to_vmem [thread:$0]  %s11640_s0, 256, %s31_s29, [#allocation3], %s11658_s17, %s11658_s17, %s10629_s16  }
  0x48   :  { %p10529_p4 = scmp.ne.s32.totalorder %s11646_s6, %s10528_s18  ;;  %p10532_p5 = scmp.lt.u32.totalorder %s10528_s18, %s11646_s6 }
  0x4a   :  { %p10534_p6 = pnand %p10532_p5, %p10529_p4 }
  0x4c   :  { %10537 = shalt.err (!%p10534_p6)
}
  0x4d   :  { %s10538_s26 = scalar_lea.vmem %s63_s20, 512  ;;  %p10543_p8 = scmp.lt.s32.totalorder %s63_s20, %s63_s20 }
  0x4e   :  { %p10539_p7 = scmp.ne.s32.totalorder %s63_s20, %s10538_s26  ;;  %p10544_p9 = scmp.lt.s32.totalorder %s10538_s26, %s10538_s26 }
  0x50   :  { %p10545_p10 = por %p10544_p9, %p10543_p8 }
  0x52   :  { %p10546_p11 = pnand %p10545_p10, %p10539_p7 }
  0x54   :  { %10549 = shalt.err (!%p10546_p11)
}
  0x55   :  { %68 = dma.hbm_to_vmem [thread:$0]  %s11646_s6, 512, %s63_s20, [#allocation6], %s11658_s17, %s11658_s17, %s10629_s16  }
  0x56   :  { %s10635_s27 = smov [#allocation10]   ;;  %s10636_s28 = smov [#allocation13]  }
  0x57   :  { %s86_s10 = sshll.u32 %s10635_s27, 4  ;;  %s112_s3 = sshll.u32 %s10636_s28, 4  ;;  %s87_s10 = int_to_ptr.vmem [resolvable:$true] %s86_s10  ;;  %s113_s3 = int_to_ptr.vmem [resolvable:$true] %s112_s3 }
  0x58   :  { %s10550_s18 = scalar_lea.hbm %s11648_s8, 256 }
  0x59   :  { %p10551_p12 = scmp.ne.s32.totalorder %s11648_s8, %s10550_s18  ;;  %p10554_p13 = scmp.lt.u32.totalorder %s10550_s18, %s11648_s8 }
  0x5b   :  { %p10556_p0 = pnand %p10554_p13, %p10551_p12 }
  0x5d   :  { %10559 = shalt.err (!%p10556_p0)
}
  0x5e   :  { %s10560_s6 = scalar_lea.vmem %s87_s10, 256  ;;  %p10565_p2 = scmp.lt.s32.totalorder %s87_s10, %s87_s10 }
  0x5f   :  { %p10561_p1 = scmp.ne.s32.totalorder %s87_s10, %s10560_s6  ;;  %p10566_p3 = scmp.lt.s32.totalorder %s10560_s6, %s10560_s6 }
  0x61   :  { %p10567_p4 = por %p10566_p3, %p10565_p2 }
  0x63   :  { %p10568_p5 = pnand %p10567_p4, %p10561_p1 }
  0x65   :  { %10571 = shalt.err (!%p10568_p5)
}
  0x66   :  { %92 = dma.hbm_to_vmem [thread:$0]  %s11648_s8, 256, %s87_s10, [#allocation9], %s11658_s17, %s11658_s17, %s10629_s16  }
  0x67   :  { %s10572_s27 = scalar_lea.hbm %s11651_s11, 64 }
  0x68   :  { %p10573_p6 = scmp.ne.s32.totalorder %s11651_s11, %s10572_s27  ;;  %p10576_p7 = scmp.lt.u32.totalorder %s10572_s27, %s11651_s11 }
  0x6a   :  { %p10578_p8 = pnand %p10576_p7, %p10573_p6 }
  0x6c   :  { %10581 = shalt.err (!%p10578_p8)
}
  0x6d   :  { %s10582_s22 = scalar_lea.vmem %s113_s3, 64  ;;  %p10587_p10 = scmp.lt.s32.totalorder %s113_s3, %s113_s3 }
  0x6e   :  { %p10583_p9 = scmp.ne.s32.totalorder %s113_s3, %s10582_s22  ;;  %p10588_p11 = scmp.lt.s32.totalorder %s10582_s22, %s10582_s22 }
  0x70   :  { %p10589_p12 = por %p10588_p11, %p10587_p10 }
  0x72   :  { %p10590_p13 = pnand %p10589_p12, %p10583_p9 }
  0x74   :  { %10593 = shalt.err (!%p10590_p13)
}
  0x75   :  { %118 = dma.hbm_to_vmem [thread:$0]  %s11651_s11, 64, %s113_s3, [#allocation12], %s10631_s7, %s10631_s7, %s10632_s21  }
  0x76   :  { %10616 = dma.done.wait [#allocation3], 256  }
  0x77   :  { %10617 = vsyncadd [#allocation3], 4294967040 }
  0x78   :  { %10618 = dma.done.wait [#allocation6], 1024  }
  0x79   :  { %10619 = vsyncadd [#allocation6], 4294966272 }
  0x7a   :  { %10620 = dma.done.wait [#allocation9], 768  }
  0x7b   :  { %10621 = vsyncadd [#allocation9], 4294966528 }
  0x7c   :  { %10622 = dma.done.wait [#allocation12], 128  }
  0x7d   :  { %10623 = vsyncadd [#allocation12], 4294967168  ;;  %v150_v0 = vld [vmem:[%s11641_s1] sm:$0xff]  ;;  %v151_v1 = vld [vmem:[%s11641_s1 + $0x8] sm:$0xff]  ;;  %vm154_vm0 = vcmask 261120   ;;  %v10637_v48 = vmov 0  }
  0x7e   :  { %v152_v2 = vld [vmem:[%s11641_s1 + $0x10] sm:$0xff]  ;;  %v162_v3 = vand.u32 4294901760, %v150_v0  ;;  %v165_v4 = vand.u32 4294901760, %v151_v1  ;;  %v153_v5 = vld [vmem:[%s11641_s1 + $0x18] sm:$0xff]  ;;  %v10849_v7 = vld [vmem:[#allocation2] sm:$0xff]  ;;  %10291 = vset.pattern.permute.xlu0 %v10637_v48  ;;  %vm1835_vm1 = vcmask 1041409  }
  0x7f   :  { %v168_v6 = vand.u32 4294901760, %v152_v2  ;;  %v10851_v8 = vld [vmem:[#allocation2 + $0x8] sm:$0xff]  ;;  %v171_v9 = vand.u32 4294901760, %v153_v5  ;;  %10292 = vtanh.f32 %v10849_v7  ;;  %v744_v49 = vld [vmem:[#allocation5] sm:$0xff]  ;;  %v745_v50 = vld [vmem:[#allocation5 + $0x8] sm:$0xff]  ;;  %v749_v52 = vsel %vm154_vm0, %v10849_v7, 0 }
  0x80   :  { %v10854_v10 = vpack.c.bf16 %v165_v4, %v162_v3  ;;  %v252_v11 = vsub.f32 %v150_v0, %v162_v3  ;;  %v259_v12 = vsub.f32 %v151_v1, %v165_v4  ;;  %10294 = vtanh.f32 %v10851_v8  ;;  %v746_v51 = vld [vmem:[#allocation5 + $0x10] sm:$0xff]  ;;  %v747_v56 = vld [vmem:[#allocation5 + $0x18] sm:$0xff]  ;;  %v1829_v59 = vld [vmem:[#allocation8] sm:$0xff]  ;;  %s10641_s30 = smov 96   ;;  %s10642_s18 = smov 16  }
  0x81   :  { %v10857_v13 = vpack.c.bf16 %v171_v9, %v168_v6  ;;  %v266_v18 = vsub.f32 %v152_v2, %v168_v6  ;;  %v273_v19 = vsub.f32 %v153_v5, %v171_v9  ;;  %v752_v53 = vsel %vm154_vm0, %v10851_v8, 0  ;;  %v1830_v62 = vld [vmem:[#allocation8 + $0x8] sm:$0xff]  ;;  %v1831_v0 = vld [vmem:[#allocation8 + $0x10] sm:$0xff]  ;;  %v1832_v1 = vld [vmem:[#allocation8 + $0x18] sm:$0xff]  ;;  %s10644_s1 = smov [#allocation14]  }
  0x82   :  { %9690 = vmatprep.subr.bf16.mxu0 %v10854_v10  ;;  %v253_v14 = vand.u32 4294901760, %v252_v11  ;;  %v260_v15 = vand.u32 4294901760, %v259_v12  ;;  %v9705_v44 = vpack.c.bf16 %v259_v12, %v252_v11  ;;  %v755_v54 = vand.u32 4294901760, %v744_v49  ;;  %s8499_s3 = sshll.u32 %s10644_s1, 4  ;;  %s8500_s3 = int_to_ptr.vmem [resolvable:$true] %s8499_s3 }
  0x83   :  { %9692 = vmatpush3.bf16.msra.mxu0 %v10854_v10  ;;  %v267_v23 = vand.u32 4294901760, %v266_v18  ;;  %v274_v24 = vand.u32 4294901760, %v273_v19  ;;  %v9709_v45 = vpack.c.bf16 %v273_v19, %v266_v18  ;;  %v758_v55 = vand.u32 4294901760, %v745_v50  ;;  %s10594_s20 = scalar_lea.vmem %s8500_s3, 32  ;;  %p10599_p1 = scmp.lt.s32.totalorder %s8500_s3, %s8500_s3 }
  0x84   :  { %9694 = vmatprep.subr.bf16.mxu0 %v10857_v13  ;;  %v254_v16 = vsub.f32 %v252_v11, %v253_v14  ;;  %v261_v17 = vsub.f32 %v259_v12, %v260_v15  ;;  %v9721_v46 = vpack.c.bf16 %v260_v15, %v253_v14  ;;  %v761_v57 = vand.u32 4294901760, %v746_v51  ;;  %p10595_p0 = scmp.ne.s32.totalorder %s8500_s3, %s10594_s20  ;;  %p10600_p2 = scmp.lt.s32.totalorder %s10594_s20, %s10594_s20 }
  0x85   :  { %v268_v31 = vsub.f32 %v266_v18, %v267_v23  ;;  %v275_v32 = vsub.f32 %v273_v19, %v274_v24  ;;  %v9725_v47 = vpack.c.bf16 %v274_v24, %v267_v23  ;;  %v10877_v58 = vand.u32 4294901760, %v749_v52 }
  0x86   :  { %v255_v20 = vand.u32 4294901760, %v254_v16  ;;  %v262_v21 = vand.u32 4294901760, %v261_v17  ;;  %v764_v60 = vand.u32 4294901760, %v747_v56  ;;  %v10879_v61 = vand.u32 4294901760, %v752_v53  ;;  %p10601_p3 = por %p10600_p2, %p10599_p1 }
  0x87   :  { %9696 = vmatpush3.bf16.msra.mxu0 %v10857_v13  ;;  %v269_v37 = vand.u32 4294901760, %v268_v31  ;;  %v276_v38 = vand.u32 4294901760, %v275_v32  ;;  %v1840_v63 = vand.u32 4294901760, %v1829_v59  ;;  %v10881_v2 = vpack.c.bf16 %v758_v55, %v755_v54  ;;  %8982 = vmatprep.mubr.f32.mxu1 %v10877_v58 }
  0x88   :  { %v9697_v22 = vpack.c.bf16 %v262_v21, %v255_v20  ;;  %v10884_v3 = vsub.f32 %v749_v52, %v10877_v58  ;;  %v1843_v4 = vand.u32 4294901760, %v1830_v62  ;;  %v1846_v5 = vand.u32 4294901760, %v1831_v0  ;;  %p10602_p4 = pnand %p10601_p3, %p10595_p0 }
  0x89   :  { %v10293_v25 = vpop.eup %10292  ;;  %v9701_v43 = vpack.c.bf16 %v276_v38, %v269_v37  ;;  %v10887_v6 = vpack.c.bf16 %v764_v60, %v761_v57  ;;  %v10890_v9 = vsub.f32 %v752_v53, %v10879_v61  ;;  %v10906_v18 = vsub.f32 %v744_v49, %v755_v54 }
  0x8a   :  { %v10295_v26 = vpop.eup %10294  ;;  %v156_v27 = vsel %vm154_vm0, %v10293_v25, 0  ;;  %9698 = vmatprep.subr.bf16.mxu0 %v9697_v22  ;;  %v825_v11 = vand.u32 4294901760, %v10884_v3  ;;  %v10894_v12 = vpack.c.bf16 %v1843_v4, %v1840_v63  ;;  %v10898_v14 = vsub.f32 %v1830_v62, %v1843_v4 }
  0x8b   :  { %v230_v28 = vand.u32 4294901760, %v156_v27  ;;  %v159_v29 = vsel %vm154_vm0, %v10295_v26, 0  ;;  %v835_v15 = vand.u32 4294901760, %v10890_v9  ;;  %v10902_v16 = vsub.f32 %v1831_v0, %v1846_v5 }
  0x8c   :  { %v240_v30 = vand.u32 4294901760, %v159_v29  ;;  %v826_v19 = vsub.f32 %v10884_v3, %v825_v11  ;;  %v10912_v20 = vsub.f32 %v745_v50, %v758_v55  ;;  %v1833_v23 = vrot.slane %v10849_v7, 7 }
  0x8d   :  { %v231_v33 = vsub.f32 %v156_v27, %v230_v28  ;;  %v836_v21 = vsub.f32 %v10890_v9, %v835_v15  ;;  %v1834_v24 = vrot.slane %v10851_v8, 6  ;;  %v1928_v31 = vand.u32 4294901760, %v10898_v14 }
  0x8e   :  { %v241_v34 = vsub.f32 %v159_v29, %v240_v30  ;;  %v827_v25 = vand.u32 4294901760, %v826_v19  ;;  %v853_v26 = vand.u32 4294901760, %v10912_v20  ;;  %v10638_v32 = vmov 0.0|0.0  }
  0x8f   :  { %v232_v35 = vand.u32 4294901760, %v231_v33  ;;  %vm10639_vm2 = vmmov 0   ;;  %vm689_vm3 = vcmask 7168   ;;  %vm2828_vm4 = vcmask 130048  }
  0x90   :  { %v242_v36 = vand.u32 4294901760, %v241_v34 }
  0x91   :  { %v233_v39 = vsub.f32 %v231_v33, %v232_v35 }
  0x92   :  { %v243_v40 = vsub.f32 %v241_v34, %v242_v36 }
  0x93   :  { %v234_v41 = vand.u32 4294901760, %v233_v39  ;;  %v1929_v39 = vsub.f32 %v10898_v14, %v1928_v31 }
  0x94   :  { %v244_v42 = vand.u32 4294901760, %v243_v40  ;;  %v10943_v40 = vsub.f32 %v747_v56, %v764_v60 }
  0x95   :  { %8905 = vmatprep.mubr.f32.mxu0 %v234_v41 }
  0x96   :  { %8906 = vmatmul.mubr.f32.vlgmr.msra.gmra.mrb[0].mxu0 %v244_v42  ;;  %v867_v48 = vand.u32 4294901760, %v10943_v40 }
  0x97   :  { %9700 = vmatpush3.bf16.msra.mxu0 %v9697_v22  ;;  %8916 = vmatprep.mubr.f32.mxu0 %v230_v28  ;;  %v846_v22 = vand.u32 4294901760, %v10906_v18 }
  0x98   :  { %9702 = vmatprep.subr.bf16.mxu0 %v9701_v43  ;;  %v868_v55 = vsub.f32 %v10943_v40, %v867_v48 }
  0x99   :  { %v847_v29 = vsub.f32 %v10906_v18, %v846_v22 }
  0x9a   :  { %v869_v60 = vand.u32 4294901760, %v868_v55 }
  0x9b   :  { %9704 = vmatpush3.bf16.msra.mxu0 %v9701_v43  ;;  %v848_v37 = vand.u32 4294901760, %v847_v29 }
  0x9c   :  { %9706 = vmatprep.subr.bf16.mxu0 %v9705_v44 }
  0x9e   :  { %8917 = vmatmul.mubr.f32.vlgmr.msra.gmra.mrb[0].mxu0 %v240_v30 }
  0x9f   :  { %9708 = vmatpush3.bf16.msra.mxu0 %v9705_v44  ;;  %8927 = vmatprep.mubr.f32.mxu0 %v231_v33  ;;  %v854_v33 = vsub.f32 %v10912_v20, %v853_v26  ;;  %v1935_v44 = vand.u32 4294901760, %v10902_v16 }
  0xa0   :  { %9710 = vmatprep.subr.bf16.mxu0 %v9709_v45 }
  0xa1   :  { %v855_v42 = vand.u32 4294901760, %v854_v33  ;;  %v1936_v53 = vsub.f32 %v10902_v16, %v1935_v44 }
  0xa3   :  { %9712 = vmatpush3.bf16.msra.mxu0 %v9709_v45  ;;  %v10640_v45 = vmov 0.0   ;;  %v9745_v50 = vpack.c.bf16 %v855_v42, %v848_v37 }
  0xa4   :  { %9714 = vmatprep.subr.bf16.mxu0 %v10854_v10 }
  0xa5   :  { %9746 = vmatprep.subr.bf16.mxu1 %v9745_v50 }
  0xa6   :  { %8928 = vmatmul.mubr.f32.vlgmr.msra.gmra.mrb[0].mxu0 %v241_v34  ;;  %9748 = vmatpush3.bf16.msra.mxu1 %v9745_v50 }
  0xa7   :  { %9716 = vmatpush3.bf16.msra.mxu0 %v10854_v10  ;;  %8938 = vmatprep.mubr.f32.mxu0 %v232_v35 }
  0xa8   :  { %9718 = vmatprep.subr.bf16.mxu0 %v10857_v13 }
  0xab   :  { %9720 = vmatpush3.bf16.msra.mxu0 %v10857_v13 }
  0xac   :  { %9722 = vmatprep.subr.bf16.mxu0 %v9721_v46 }
  0xae   :  { %8939 = vmatmul.mubr.f32.vlgmr.msra.gmra.mrb[0].mxu0 %v242_v36  ;;  %v10936_v36 = vsub.f32 %v746_v51, %v761_v57  ;;  %v1930_v51 = vand.u32 4294901760, %v1929_v39 }
  0xaf   :  { %9724 = vmatpush3.bf16.msra.mxu0 %v9721_v46  ;;  %8949 = vmatprep.mubr.f32.mxu0 %v230_v28 }
  0xb0   :  { %9726 = vmatprep.subr.bf16.mxu0 %v9725_v47  ;;  %v860_v43 = vand.u32 4294901760, %v10936_v36  ;;  %v9757_v19 = vpack.c.bf16 %v10943_v40, %v10936_v36 }
  0xb2   :  { %v861_v52 = vsub.f32 %v10936_v36, %v860_v43 }
  0xb3   :  { %9728 = vmatpush3.bf16.msra.mxu0 %v9725_v47 }
  0xb4   :  { %9730 = vmatprep.subr.bf16.mxu0 %v10854_v10  ;;  %v862_v57 = vand.u32 4294901760, %v861_v52 }
  0xb6   :  { %8950 = vmatmul.mubr.f32.vlgmr.msra.gmra.mrb[0].mxu0 %v240_v30  ;;  %v9749_v4 = vpack.c.bf16 %v869_v60, %v862_v57 }
  0xb7   :  { %9732 = vmatpush3.bf16.msra.mxu0 %v10854_v10  ;;  %8960 = vmatprep.mubr.f32.mxu0 %v230_v28  ;;  %v1849_v10 = vand.u32 4294901760, %v1832_v1  ;;  %v837_v28 = vand.u32 4294901760, %v836_v21 }
  0xb8   :  { %9734 = vmatprep.subr.bf16.mxu0 %v10857_v13  ;;  %9750 = vmatprep.subr.bf16.mxu1 %v9749_v4 }
  0xb9   :  { %v10904_v17 = vsub.f32 %v1832_v1, %v1849_v10  ;;  %v10945_v41 = vpack.c.bf16 %v1849_v10, %v1846_v5  ;;  %v9753_v5 = vpack.c.bf16 %v10912_v20, %v10906_v18  ;;  %9752 = vmatpush3.bf16.msra.mxu1 %v9749_v4  ;;  %v1825_v4 = vld [vmem:[#allocation7] sm:$0xff] }
  0xbb   :  { %9736 = vmatpush3.bf16.msra.mxu0 %v10857_v13  ;;  %v10896_v13 = vsub.f32 %v1829_v59, %v1840_v63  ;;  %v1942_v49 = vand.u32 4294901760, %v10904_v17  ;;  %v1937_v63 = vand.u32 4294901760, %v1936_v53  ;;  %9754 = vmatprep.subr.bf16.mxu1 %v9753_v5 }
  0xbc   :  { %9738 = vmatprep.subr.bf16.mxu0 %v10881_v2  ;;  %8983 = vmatmul.mubr.f32.vlgmr.msra.gmra.mrb[0].mxu1 %v10879_v61 }
  0xbd   :  { %v1921_v27 = vand.u32 4294901760, %v10896_v13  ;;  %v1943_v56 = vsub.f32 %v10904_v17, %v1942_v49  ;;  %9756 = vmatpush3.bf16.msra.mxu1 %v9753_v5  ;;  %v9846_v21 = vpack.c.bf16 %v10898_v14, %v10896_v13  ;;  %8993 = vmatprep.mubr.f32.mxu1 %v10884_v3  ;;  %v9861_v60 = vpack.c.bf16 %v1942_v49, %v1935_v44  ;;  %v1826_v5 = vld [vmem:[#allocation7 + $0x8] sm:$0xff] }
  0xbe   :  { %8961 = vmatmul.mubr.f32.vlgmr.msra.gmra.mrb[0].mxu0 %v240_v30  ;;  %v1836_v30 = vsel %vm1835_vm1, %v1834_v24, %v1833_v23  ;;  %9758 = vmatprep.subr.bf16.mxu1 %v9757_v19  ;;  %v9849_v23 = vpack.c.bf16 %v10904_v17, %v10902_v16  ;;  %v9769_v24 = vpack.c.bf16 %v853_v26, %v846_v22 }
  0xbf   :  { %9740 = vmatpush3.bf16.msra.mxu0 %v10881_v2  ;;  %8971 = vmatprep.mubr.f32.mxu0 %v827_v25  ;;  %v1837_v34 = vsel %vm154_vm0, %v1836_v30, 0  ;;  %v1922_v35 = vsub.f32 %v10896_v13, %v1921_v27  ;;  %v1944_v0 = vand.u32 4294901760, %v1943_v56  ;;  %v9773_v25 = vpack.c.bf16 %v867_v48, %v860_v43 }
  0xc0   :  { %9742 = vmatprep.subr.bf16.mxu0 %v10887_v6  ;;  %v10938_v38 = vand.u32 4294901760, %v1837_v34  ;;  %v9858_v3 = vpack.c.bf16 %v1928_v31, %v1921_v27 }
  0xc1   :  { %v1923_v47 = vand.u32 4294901760, %v1922_v35  ;;  %v9843_v10 = vpack.c.bf16 %v1944_v0, %v1937_v63  ;;  %9760 = vmatpush3.bf16.msra.mxu1 %v9757_v19  ;;  %v740_v63 = vld [vmem:[%s11642_s2] sm:$0xff]  ;;  %v741_v0 = vld [vmem:[%s11642_s2 + $0x8] sm:$0xff]  ;;  %v2333_v19 = vand.u32 4294901760, %v1826_v5 }
  0xc2   :  { %v10953_v46 = vsub.f32 %v1837_v34, %v10938_v38  ;;  %9762 = vmatprep.subr.bf16.mxu1 %v10881_v2  ;;  %v1289_v16 = vand.u32 4294901760, %v740_v63  ;;  %v1292_v17 = vand.u32 4294901760, %v741_v0 }
  0xc3   :  { %9744 = vmatpush3.bf16.msra.mxu0 %v10887_v6  ;;  %v9840_v62 = vpack.c.bf16 %v1930_v51, %v1923_v47 }
  0xc4   :  { %9833 = vmatprep.subr.bf16.mxu0 %v10638_v32  ;;  %v1910_v54 = vand.u32 4294901760, %v10953_v46  ;;  %8994 = vmatmul.mubr.f32.vlgmr.msra.gmra.mrb[0].mxu1 %v10890_v9  ;;  %v11048_v44 = vpack.c.bf16 %v1292_v17, %v1289_v16  ;;  %v11050_v49 = vsub.f32 %v740_v63, %v1289_v16 }
  0xc5   :  { %9764 = vmatpush3.bf16.msra.mxu1 %v10881_v2  ;;  %9004 = vmatprep.mubr.f32.mxu1 %v825_v11 }
  0xc6   :  { %8972 = vmatmul.mubr.f32.vlgmr.msra.gmra.mrb[2].mxu0 %v837_v28  ;;  %v1911_v59 = vsub.f32 %v10953_v46, %v1910_v54  ;;  %9766 = vmatprep.subr.bf16.mxu1 %v10887_v6 }
  0xc7   :  { %9835 = vmatpush3.bf16.msra.mxu0 %v10894_v12  ;;  %9103 = vmatprep.mubr.msk.f32.mxu0 %vm10639_vm2, %v10640_v45 }
  0xc8   :  { %9836 = vmatprep.subr.bf16.mxu0 %v10638_v32  ;;  %v1912_v1 = vand.u32 4294901760, %v1911_v59 }
  0xc9   :  { %9768 = vmatpush3.bf16.msra.mxu1 %v10887_v6 }
  0xca   :  { %9770 = vmatprep.subr.bf16.mxu1 %v9769_v24 }
  0xcb   :  { %9838 = vmatpush3.bf16.msra.mxu0 %v10945_v41 }
  0xcc   :  { %9839 = vmatprep.subr.bf16.mxu0 %v10638_v32  ;;  %9005 = vmatmul.mubr.f32.vlgmr.msra.gmra.mrb[0].mxu1 %v835_v15 }
  0xcd   :  { %9772 = vmatpush3.bf16.msra.mxu1 %v9769_v24  ;;  %9015 = vmatprep.mubr.f32.mxu1 %v10877_v58  ;;  %v1380_v24 = vand.u32 4294901760, %v11050_v49 }
  0xce   :  { %9104 = vmatmul.mubr.f32.vlgmr.msra.gmra.mrb[4].mxu0 %v1912_v1  ;;  %9774 = vmatprep.subr.bf16.mxu1 %v9773_v25  ;;  %v11052_v1 = vsub.f32 %v741_v0, %v1292_v17 }
  0xcf   :  { %9841 = vmatpush3.bf16.msra.mxu0 %v9840_v62  ;;  %9114 = vmatprep.mubr.msk.f32.mxu0 %vm10639_vm2, %v10640_v45 }
  0xd0   :  { %9842 = vmatprep.subr.bf16.mxu0 %v10638_v32 }
  0xd1   :  { %9776 = vmatpush3.bf16.msra.mxu1 %v9773_v25 }
  0xd2   :  { %9778 = vmatprep.subr.bf16.mxu1 %v10881_v2 }
  0xd3   :  { %9844 = vmatpush3.bf16.msra.mxu0 %v9843_v10  ;;  %v742_v10 = vld [vmem:[%s11642_s2 + $0x10] sm:$0xff] }
  0xd4   :  { %9845 = vmatprep.subr.bf16.mxu0 %v10638_v32  ;;  %9016 = vmatmul.mubr.f32.vlgmr.msra.gmra.mrb[0].mxu1 %v10879_v61 }
  0xd5   :  { %9780 = vmatpush3.bf16.msra.mxu1 %v10881_v2  ;;  %9026 = vmatprep.mubr.f32.mxu1 %v10877_v58 }
  0xd6   :  { %9115 = vmatmul.mubr.f32.vlgmr.msra.gmra.mrb[4].mxu0 %v10938_v38  ;;  %9782 = vmatprep.subr.bf16.mxu1 %v10887_v6 }
  0xd7   :  { %9847 = vmatpush3.bf16.msra.mxu0 %v9846_v21  ;;  %9125 = vmatprep.mubr.msk.f32.mxu0 %vm10639_vm2, %v10640_v45  ;;  %v743_v21 = vld [vmem:[%s11642_s2 + $0x18] sm:$0xff] }
  0xd8   :  { %9848 = vmatprep.subr.bf16.mxu0 %v10638_v32  ;;  %v1298_v25 = vand.u32 4294901760, %v743_v21 }
  0xd9   :  { %9784 = vmatpush3.bf16.msra.mxu1 %v10887_v6 }
  0xda   :  { %9786 = vmatprep.subr.bf16.mxu1 %v11048_v44 }
  0xdb   :  { %9850 = vmatpush3.bf16.msra.mxu0 %v9849_v23  ;;  %v1295_v23 = vand.u32 4294901760, %v742_v10 }
  0xdc   :  { %9851 = vmatprep.subr.bf16.mxu0 %v10638_v32  ;;  %9027 = vmatmul.mubr.f32.vlgmr.msra.gmra.mrb[0].mxu1 %v10879_v61 }
  0xdd   :  { %9788 = vmatpush3.bf16.msra.mxu1 %v11048_v44 }
  0xde   :  { %9126 = vmatmul.mubr.f32.vlgmr.msra.gmra.mrb[4].mxu0 %v10953_v46 }
  0xdf   :  { %9853 = vmatpush3.bf16.msra.mxu0 %v10894_v12  ;;  %9136 = vmatprep.mubr.msk.f32.mxu0 %vm10639_vm2, %v10640_v45 }
  0xe0   :  { %9854 = vmatprep.subr.bf16.mxu0 %v10638_v32 }
  0xe3   :  { %9856 = vmatpush3.bf16.msra.mxu0 %v10945_v41 }
  0xe4   :  { %9857 = vmatprep.subr.bf16.mxu0 %v10638_v32 }
  0xe6   :  { %9137 = vmatmul.mubr.f32.vlgmr.msra.gmra.mrb[4].mxu0 %v1910_v54 }
  0xe7   :  { %9859 = vmatpush3.bf16.msra.mxu0 %v9858_v3  ;;  %9147 = vmatprep.mubr.msk.f32.mxu0 %vm10639_vm2, %v10640_v45  ;;  %v1387_v3 = vand.u32 4294901760, %v11052_v1 }
  0xe8   :  { %9860 = vmatprep.subr.bf16.mxu0 %v10638_v32 }
  0xe9   :  { %v11105_v63 = vpack.c.bf16 %v1387_v3, %v1380_v24 }
  0xeb   :  { %9862 = vmatpush3.bf16.msra.mxu0 %v9861_v60 }
  0xec   :  { %9863 = vmatprep.subr.bf16.mxu0 %v10638_v32 }
  0xee   :  { %9148 = vmatmul.mubr.f32.vlgmr.msra.gmra.mrb[4].mxu0 %v10938_v38 }
  0xef   :  { %9865 = vmatpush3.bf16.msra.mxu0 %v10894_v12  ;;  %9158 = vmatprep.mubr.msk.f32.mxu0 %vm10639_vm2, %v10640_v45  ;;  %v2330_v12 = vand.u32 4294901760, %v1825_v4 }
  0xf0   :  { %9866 = vmatprep.subr.bf16.mxu0 %v10638_v32 }
  0xf3   :  { %9868 = vmatpush3.bf16.msra.mxu0 %v10945_v41  ;;  %v11068_v41 = vsub.f32 %v1825_v4, %v2330_v12 }
  0xf4   :  { %9869 = vmatprep.subr.bf16.mxu0 %v10638_v32 }
  0xf6   :  { %9159 = vmatmul.mubr.f32.vlgmr.msra.gmra.mrb[4].mxu0 %v10938_v38 }
  0xf7   :  { %9169 = vmatprep.mubr.msk.f32.mxu0 %vm10639_vm2, %v10640_v45 }
 0x191   :  { %v8962_v9 = vpop.f32.mrb[0].mxu0 }
 0x192   :  { %v697_v11 = vsel %vm689_vm3, %v8962_v9, -inf  ;;  %v679_v13 = vpop.f32.mrb[1].mxu0 }
 0x193   :  { %v698_v14 = vrot.slane %v697_v11, 4  ;;  %v690_v15 = vsel %vm689_vm3, %v679_v13, -inf }
 0x194   :  { %v691_v18 = vrot.slane %v690_v15, 4 }
 0x195   :  { %v699_v20 = vmax.f32 %v697_v11, %v698_v14  ;;  %v11070_v11 = vsub.f32 %v1826_v5, %v2333_v19  ;;  %v11074_v14 = vpack.c.bf16 %v1298_v25, %v1295_v23 }
 0x196   :  { %v692_v22 = vmax.f32 %v690_v15, %v691_v18  ;;  %v1827_v15 = vld [vmem:[#allocation7 + $0x10] sm:$0xff]  ;;  %v1828_v18 = vld [vmem:[#allocation7 + $0x18] sm:$0xff] }
 0x197   :  { %v700_v2 = vrot.slane %v699_v20, 2  ;;  %9790 = vmatprep.subr.bf16.mxu1 %v11074_v14 }
 0x198   :  { %v693_v26 = vrot.slane %v692_v22, 2  ;;  %9792 = vmatpush3.bf16.msra.mxu1 %v11074_v14 }
 0x199   :  { %v701_v58 = vmax.f32 %v699_v20, %v700_v2  ;;  %v1388_v20 = vsub.f32 %v11052_v1, %v1387_v3  ;;  %v1400_v2 = vsub.f32 %v743_v21, %v1298_v25  ;;  %v11113_v4 = vpop.f32.mrb[2].mxu0 }
 0x19a   :  { %v694_v27 = vmax.f32 %v692_v22, %v693_v26  ;;  %v1393_v22 = vsub.f32 %v742_v10, %v1295_v23  ;;  %v2336_v26 = vand.u32 4294901760, %v1827_v15  ;;  %v11115_v5 = vpop.f32.mrb[3].mxu0 }
 0x19b   :  { %v702_v28 = vrot.slane %v701_v58, 1  ;;  %v1389_v38 = vand.u32 4294901760, %v1388_v20 }
 0x19c   :  { %v695_v29 = vrot.slane %v694_v27, 1  ;;  %v9805_v60 = vpack.c.bf16 %v1400_v2, %v1393_v22 }
 0x19d   :  { %v703_v6 = vmax.f32 %v701_v58, %v702_v28  ;;  %v2339_v58 = vand.u32 4294901760, %v1828_v18  ;;  %v2411_v28 = vand.u32 4294901760, %v11068_v41 }
 0x19e   :  { %v696_v30 = vmax.f32 %v694_v27, %v695_v29  ;;  %v2418_v29 = vand.u32 4294901760, %v11070_v11 }
 0x19f   :  { %v705_v61 = vsub.f32 %v8962_v9, %v703_v6  ;;  %v11066_v9 = vpack.c.bf16 %v2333_v19, %v2330_v12  ;;  %v1394_v6 = vand.u32 4294901760, %v1393_v22 }
 0x1a0   :  { %v704_v31 = vsub.f32 %v679_v13, %v696_v30  ;;  %v1381_v13 = vsub.f32 %v11050_v49, %v1380_v24  ;;  %v1401_v30 = vand.u32 4294901760, %v1400_v2  ;;  %v11107_v0 = vpack.c.bf16 %v2418_v29, %v2411_v28 }
 0x1a1   :  { %v708_v33 = vmul.f32 1.442695, %v705_v61  ;;  %9871 = vmatpush3.bf16.msra.mxu0 %v11066_v9  ;;  %v11085_v61 = vpack.c.bf16 %v2339_v58, %v2336_v26 }
 0x1a2   :  { %v706_v34 = vmul.f32 1.442695, %v704_v31  ;;  %v1382_v27 = vand.u32 4294901760, %v1381_v13  ;;  %9872 = vmatprep.subr.bf16.mxu0 %v10638_v32  ;;  %v11087_v31 = vsub.f32 %v1827_v15, %v2336_v26  ;;  %v11109_v16 = vpack.c.bf16 %v1401_v30, %v1394_v6 }
 0x1a3   :  { %10296 = vpow2.f32 %v708_v33  ;;  %v11089_v33 = vsub.f32 %v1828_v18, %v2339_v58 }
 0x1a4   :  { %10298 = vpow2.f32 %v706_v34  ;;  %v2412_v34 = vsub.f32 %v11068_v41, %v2411_v28 }
 0x1a5   :  { %9874 = vmatpush3.bf16.msra.mxu0 %v11085_v61 }
 0x1a6   :  { %9875 = vmatprep.subr.bf16.mxu0 %v10638_v32 }
 0x1ad   :  { %v10297_v35 = vpop.eup %10296 }
 0x1ae   :  { %v10299_v36 = vpop.eup %10298  ;;  %v717_v37 = vsel %vm689_vm3, %v10297_v35, 0.0 }
 0x1af   :  { %v718_v39 = vrot.slane %v717_v37, 4  ;;  %v710_v40 = vsel %vm689_vm3, %v10299_v36, 0.0 }
 0x1b0   :  { %v711_v42 = vrot.slane %v710_v40, 4 }
 0x1b1   :  { %v719_v43 = vadd.f32 %v718_v39, %v717_v37  ;;  %v1395_v37 = vsub.f32 %v1393_v22, %v1394_v6  ;;  %v1402_v39 = vsub.f32 %v1400_v2, %v1401_v30  ;;  %v2827_v6 = vld [vmem:[#allocation10 + $0x8] sm:$0xff]  ;;  %v2823_v30 = vld [vmem:[#allocation11 + $0x2] sm:$0x3] }
 0x1b2   :  { %v712_v46 = vadd.f32 %v711_v42, %v710_v40  ;;  %v2413_v40 = vand.u32 4294901760, %v2412_v34  ;;  %v2425_v42 = vand.u32 4294901760, %v11087_v31  ;;  %v2830_v34 = vsel %vm2828_vm4, %v2823_v30, 0 }
 0x1b3   :  { %v720_v47 = vrot.slane %v719_v43, 2 }
 0x1b4   :  { %v713_v48 = vrot.slane %v712_v46, 2 }
 0x1b5   :  { %v721_v50 = vadd.f32 %v720_v47, %v719_v43  ;;  %v2432_v43 = vand.u32 4294901760, %v11089_v33  ;;  %v1396_v47 = vand.u32 4294901760, %v1395_v37 }
 0x1b6   :  { %v714_v51 = vadd.f32 %v713_v48, %v712_v46  ;;  %v1403_v48 = vand.u32 4294901760, %v1402_v39 }
 0x1b7   :  { %v722_v52 = vrot.slane %v721_v50, 1  ;;  %v11111_v17 = vpack.c.bf16 %v2432_v43, %v2425_v42 }
 0x1b8   :  { %v715_v53 = vrot.slane %v714_v51, 1 }
 0x1b9   :  { %v723_v54 = vadd.f32 %v722_v52, %v721_v50  ;;  %v2426_v50 = vsub.f32 %v11087_v31, %v2425_v42 }
 0x1ba   :  { %v716_v55 = vadd.f32 %v715_v53, %v714_v51  ;;  %v2433_v51 = vsub.f32 %v11089_v33, %v2432_v43  ;;  %v9797_v53 = vpack.c.bf16 %v1403_v48, %v1396_v47 }
 0x1bc   :  { %10300 = vrcp.f32 %v716_v55  ;;  %v2434_v55 = vand.u32 4294901760, %v2433_v51 }
 0x1bd   :  { %10302 = vrcp.f32 %v723_v54  ;;  %v2427_v54 = vand.u32 4294901760, %v2426_v50 }
 0x1c6   :  { %v10301_v56 = vpop.eup %10300 }
 0x1c7   :  { %v725_v57 = vmul.f32 %v10301_v56, %v10299_v36  ;;  %v10303_v59 = vpop.eup %10302  ;;  %v2419_v36 = vsub.f32 %v11070_v11, %v2418_v29  ;;  %v9879_v56 = vpack.c.bf16 %v2434_v55, %v2427_v54  ;;  %v2826_v29 = vld [vmem:[#allocation10] sm:$0xff] }
 0x1c8   :  { %v727_v62 = vmul.f32 %v10303_v59, %v10297_v35  ;;  %v9793_v35 = vpack.c.bf16 %v1389_v38, %v1382_v27  ;;  %v9882_v59 = vpack.c.bf16 %v11070_v11, %v11068_v41 }
 0x1c9   :  { %730 = vperm.xlu0 %10291, %v725_v57   ;;  %v2420_v46 = vand.u32 4294901760, %v2419_v36  ;;  %v9801_v57 = vpack.c.bf16 %v11052_v1, %v11050_v49 }
 0x1ca   :  { %9794 = vmatprep.subr.bf16.mxu1 %v9793_v35 }
 0x1cb   :  { %v9876_v52 = vpack.c.bf16 %v2420_v46, %v2413_v40 }
 0x1cd   :  { %735 = vperm.xlu0 %10291, %v727_v62   ;;  %v9885_v62 = vpack.c.bf16 %v11089_v33, %v11087_v31  ;;  %v2833_v31 = vand.u32 4294901760, %v2826_v29  ;;  %v2836_v33 = vand.u32 4294901760, %v2827_v6 }
 0x1cf   :  { %v2911_v36 = vsub.f32 %v2826_v29, %v2833_v31  ;;  %v2918_v37 = vsub.f32 %v2827_v6, %v2836_v33  ;;  %v9906_v43 = vpack.c.bf16 %v2836_v33, %v2833_v31  ;;  %v3795_v33 = vld [vmem:[%s11644_s4] sm:$0xff] }
 0x1d1   :  { %v2912_v40 = vand.u32 4294901760, %v2911_v36  ;;  %v2919_v42 = vand.u32 4294901760, %v2918_v37  ;;  %v9912_v51 = vpack.c.bf16 %v2918_v37, %v2911_v36 }
 0x1d3   :  { %v2913_v46 = vsub.f32 %v2911_v36, %v2912_v40  ;;  %v2920_v47 = vsub.f32 %v2918_v37, %v2919_v42  ;;  %v3801_v37 = vand.u32 4294901760, %v3795_v33 }
 0x1d5   :  { %v2921_v48 = vand.u32 4294901760, %v2920_v47  ;;  %v3879_v47 = vsub.f32 %v3795_v33, %v3801_v37 }
 0x248   :  { %v731_v49 = vpop.permute.xlu0 %730 }
 0x249   :  { %v738_v1 = vmul.f32 %v731_v49, %v10849_v7 }
 0x24b   :  { %v1283_v10 = vsel %vm154_vm0, %v738_v1, 0  ;;  %v2324_v24 = vrot.slane %v738_v1, 7 }
 0x24c   :  { %v11119_v12 = vand.u32 4294901760, %v1283_v10  ;;  %v736_v19 = vpop.permute.xlu0 %735 }
 0x24d   :  { %v739_v21 = vmul.f32 %v736_v19, %v10851_v8 }
 0x24e   :  { %v1358_v23 = vsub.f32 %v1283_v10, %v11119_v12 }
 0x24f   :  { %v1286_v25 = vsel %vm154_vm0, %v739_v21, 0  ;;  %v2325_v3 = vrot.slane %v739_v21, 6 }
 0x250   :  { %v11124_v41 = vand.u32 4294901760, %v1286_v25  ;;  %v1359_v11 = vand.u32 4294901760, %v1358_v23 }
 0x251   :  { %v2326_v13 = vsel %vm1835_vm1, %v2325_v3, %v2324_v24  ;;  %v3320_v24 = vld [vmem:[%s11653_s13] sm:$0xff] }
 0x252   :  { %v1368_v7 = vsub.f32 %v1286_v25, %v11124_v41  ;;  %v2327_v15 = vsel %vm154_vm0, %v2326_v13, 0  ;;  %v1360_v18 = vsub.f32 %v1358_v23, %v1359_v11  ;;  %v3321_v25 = vld [vmem:[%s11653_s13 + $0x8] sm:$0xff]  ;;  %v3335_v3 = vand.u32 4294901760, %v3320_v24  ;;  %s10643_s13 = smov 80  }
 0x253   :  { %v11129_v20 = vand.u32 4294901760, %v2327_v15 }
 0x254   :  { %v1369_v22 = vand.u32 4294901760, %v1368_v7  ;;  %v1361_v8 = vand.u32 4294901760, %v1360_v18 }
 0x255   :  { %v2399_v2 = vsub.f32 %v2327_v15, %v11129_v20 }
 0x256   :  { %9037 = vmatprep.mubr.f32.mxu1 %v1361_v8  ;;  %v1370_v26 = vsub.f32 %v1368_v7, %v1369_v22 }
 0x257   :  { %v2400_v58 = vand.u32 4294901760, %v2399_v2 }
 0x258   :  { %v1371_v27 = vand.u32 4294901760, %v1370_v26 }
 0x259   :  { %v2401_v28 = vsub.f32 %v2399_v2, %v2400_v58 }
 0x25a   :  { %9038 = vmatmul.mubr.f32.vlgmr.msra.gmra.mrb[0].mxu1 %v1371_v27 }
 0x25b   :  { %9796 = vmatpush3.bf16.msra.mxu1 %v9793_v35  ;;  %9048 = vmatprep.mubr.f32.mxu1 %v11119_v12  ;;  %v2402_v38 = vand.u32 4294901760, %v2401_v28  ;;  %v2899_v35 = vand.u32 4294901760, %v2830_v34 }
 0x25c   :  { %9798 = vmatprep.subr.bf16.mxu1 %v9797_v53 }
 0x25d   :  { %9170 = vmatmul.mubr.f32.vlgmr.msra.gmra.mrb[4].mxu0 %v2402_v38  ;;  %v2900_v39 = vsub.f32 %v2830_v34, %v2899_v35  ;;  %v3796_v34 = vld [vmem:[%s11644_s4 + $0x8] sm:$0xff] }
 0x25e   :  { %9877 = vmatpush3.bf16.msra.mxu0 %v9876_v52  ;;  %9180 = vmatprep.mubr.msk.f32.mxu0 %vm10639_vm2, %v10640_v45  ;;  %v9918_v52 = vpack.c.bf16 %v2919_v42, %v2912_v40 }
 0x25f   :  { %9800 = vmatpush3.bf16.msra.mxu1 %v9797_v53  ;;  %9878 = vmatprep.subr.bf16.mxu0 %v10638_v32 }
 0x260   :  { %9802 = vmatprep.subr.bf16.mxu1 %v9801_v57 }
 0x262   :  { %9880 = vmatpush3.bf16.msra.mxu0 %v9879_v56  ;;  %9049 = vmatmul.mubr.f32.vlgmr.msra.gmra.mrb[0].mxu1 %v11124_v41 }
 0x263   :  { %9804 = vmatpush3.bf16.msra.mxu1 %v9801_v57  ;;  %9059 = vmatprep.mubr.f32.mxu1 %v1358_v23  ;;  %v8512_v57 = vld [vmem:[%s11649_s9] ss:$0 sm:$0xff] }
 0x264   :  { %9881 = vmatprep.subr.bf16.mxu0 %v10638_v32  ;;  %9806 = vmatprep.subr.bf16.mxu1 %v9805_v60 }
 0x265   :  { %9181 = vmatmul.mubr.f32.vlgmr.msra.gmra.mrb[4].mxu0 %v11129_v20 }
 0x266   :  { %9883 = vmatpush3.bf16.msra.mxu0 %v9882_v59  ;;  %9191 = vmatprep.mubr.msk.f32.mxu0 %vm10639_vm2, %v10640_v45 }
 0x267   :  { %9808 = vmatpush3.bf16.msra.mxu1 %v9805_v60  ;;  %9884 = vmatprep.subr.bf16.mxu0 %v10638_v32 }
 0x268   :  { %9810 = vmatprep.subr.bf16.mxu1 %v11048_v44 }
 0x26a   :  { %9886 = vmatpush3.bf16.msra.mxu0 %v9885_v62  ;;  %9060 = vmatmul.mubr.f32.vlgmr.msra.gmra.mrb[0].mxu1 %v1368_v7 }
 0x26b   :  { %9812 = vmatpush3.bf16.msra.mxu1 %v11048_v44  ;;  %9070 = vmatprep.mubr.f32.mxu1 %v1359_v11  ;;  %v3413_v11 = vsub.f32 %v3320_v24, %v3335_v3 }
 0x26c   :  { %9887 = vmatprep.subr.bf16.mxu0 %v10638_v32  ;;  %9814 = vmatprep.subr.bf16.mxu1 %v11074_v14 }
 0x26d   :  { %9192 = vmatmul.mubr.f32.vlgmr.msra.gmra.mrb[4].mxu0 %v2399_v2  ;;  %v3414_v7 = vand.u32 4294901760, %v3413_v11 }
 0x26e   :  { %9889 = vmatpush3.bf16.msra.mxu0 %v11066_v9  ;;  %9202 = vmatprep.mubr.msk.f32.mxu0 %vm10639_vm2, %v10640_v45 }
 0x26f   :  { %9816 = vmatpush3.bf16.msra.mxu1 %v11074_v14  ;;  %9890 = vmatprep.subr.bf16.mxu0 %v10638_v32  ;;  %v3415_v18 = vsub.f32 %v3413_v11, %v3414_v7 }
 0x270   :  { %9818 = vmatprep.subr.bf16.mxu1 %v11105_v63 }
 0x272   :  { %9892 = vmatpush3.bf16.msra.mxu0 %v11085_v61  ;;  %9071 = vmatmul.mubr.f32.vlgmr.msra.gmra.mrb[0].mxu1 %v1369_v22  ;;  %v3416_v22 = vand.u32 4294901760, %v3415_v18 }
 0x273   :  { %9820 = vmatpush3.bf16.msra.mxu1 %v11105_v63  ;;  %9081 = vmatprep.mubr.f32.mxu1 %v11119_v12 }
 0x274   :  { %9893 = vmatprep.subr.bf16.mxu0 %v10638_v32  ;;  %9822 = vmatprep.subr.bf16.mxu1 %v11109_v16 }
 0x275   :  { %9203 = vmatmul.mubr.f32.vlgmr.msra.gmra.mrb[4].mxu0 %v2400_v58 }
 0x276   :  { %9895 = vmatpush3.bf16.msra.mxu0 %v11107_v0  ;;  %9213 = vmatprep.mubr.msk.f32.mxu0 %vm10639_vm2, %v10640_v45  ;;  %v2825_v0 = vld [vmem:[#allocation13 + $0x2] sm:$0x3] }
 0x277   :  { %9824 = vmatpush3.bf16.msra.mxu1 %v11109_v16  ;;  %9896 = vmatprep.subr.bf16.mxu0 %v10638_v32 }
 0x278   :  { %9826 = vmatprep.subr.bf16.mxu1 %v11048_v44 }
 0x27a   :  { %9898 = vmatpush3.bf16.msra.mxu0 %v11111_v17  ;;  %9082 = vmatmul.mubr.f32.vlgmr.msra.gmra.mrb[0].mxu1 %v11124_v41 }
 0x27b   :  { %9828 = vmatpush3.bf16.msra.mxu1 %v11048_v44  ;;  %9092 = vmatprep.mubr.f32.mxu1 %v11119_v12  ;;  %v2901_v44 = vand.u32 4294901760, %v2900_v39 }
 0x27c   :  { %9899 = vmatprep.subr.bf16.mxu0 %v10638_v32  ;;  %9830 = vmatprep.subr.bf16.mxu1 %v11074_v14 }
 0x27d   :  { %9214 = vmatmul.mubr.f32.vlgmr.msra.gmra.mrb[4].mxu0 %v11129_v20 }
 0x27e   :  { %9901 = vmatpush3.bf16.msra.mxu0 %v11066_v9  ;;  %9224 = vmatprep.mubr.msk.f32.mxu0 %vm10639_vm2, %v10640_v45  ;;  %v2902_v9 = vsub.f32 %v2900_v39, %v2901_v44 }
 0x27f   :  { %9832 = vmatpush3.bf16.msra.mxu1 %v11074_v14  ;;  %9902 = vmatprep.subr.bf16.mxu0 %v10638_v32  ;;  %v2914_v14 = vand.u32 4294901760, %v2913_v46 }
 0x280   :  { %9926 = vmatprep.subr.bf16.mxu1 %v10638_v32 }
 0x281   :  { %v9909_v50 = vpack.c.bf16 %v2921_v48, %v2914_v14  ;;  %v3880_v48 = vand.u32 4294901760, %v3879_v47 }
 0x282   :  { %9904 = vmatpush3.bf16.msra.mxu0 %v11085_v61  ;;  %9093 = vmatmul.mubr.f32.vlgmr.msra.gmra.mrb[0].mxu1 %v11124_v41  ;;  %v2903_v61 = vand.u32 4294901760, %v2902_v9  ;;  %v3338_v41 = vand.u32 4294901760, %v3321_v25 }
 0x283   :  { %9905 = vmatprep.subr.bf16.mxu0 %v10638_v32  ;;  %9280 = vmatprep.mubr.msk.f32.mxu1 %vm10639_vm2, %v10640_v45 }
 0x284   :  { %v3420_v13 = vsub.f32 %v3321_v25, %v3338_v41  ;;  %v9924_v58 = vpack.c.bf16 %v3338_v41, %v3335_v3 }
 0x285   :  { %9225 = vmatmul.mubr.f32.vlgmr.msra.gmra.mrb[4].mxu0 %v11129_v20 }
 0x286   :  { %9907 = vmatpush3.bf16.msra.mxu0 %v9906_v43  ;;  %9231 = vmatprep.mubr.msk.f32.mxu0 %vm10639_vm2, %v10640_v45  ;;  %v3421_v15 = vand.u32 4294901760, %v3420_v13  ;;  %v9930_v26 = vpack.c.bf16 %v3420_v13, %v3413_v11 }
 0x287   :  { %9908 = vmatprep.subr.bf16.mxu0 %v10638_v32 }
 0x288   :  { %v3422_v20 = vsub.f32 %v3420_v13, %v3421_v15  ;;  %v9936_v38 = vpack.c.bf16 %v3421_v15, %v3414_v7 }
 0x28a   :  { %v3423_v8 = vand.u32 4294901760, %v3422_v20 }
 0x28c   :  { %v9927_v2 = vpack.c.bf16 %v3423_v8, %v3416_v22 }
 0x28d   :  { %9232 = vmatmul.mubr.f32.vlgmr.msra.gmra.mrb[4].mxu0 %v2903_v61 }
 0x28e   :  { %9910 = vmatpush3.bf16.msra.mxu0 %v9909_v50  ;;  %9238 = vmatprep.mubr.msk.f32.mxu0 %vm10639_vm2, %v10640_v45 }
 0x28f   :  { %9911 = vmatprep.subr.bf16.mxu0 %v10638_v32  ;;  %9928 = vmatpush3.bf16.msra.mxu1 %v9927_v2 }
 0x290   :  { %9929 = vmatprep.subr.bf16.mxu1 %v10638_v32 }
 0x295   :  { %9239 = vmatmul.mubr.f32.vlgmr.msra.gmra.mrb[4].mxu0 %v2899_v35 }
 0x296   :  { %9913 = vmatpush3.bf16.msra.mxu0 %v9912_v51  ;;  %9245 = vmatprep.mubr.msk.f32.mxu0 %vm10639_vm2, %v10640_v45  ;;  %v3881_v51 = vsub.f32 %v3879_v47, %v3880_v48 }
 0x297   :  { %9914 = vmatprep.subr.bf16.mxu0 %v10638_v32 }
 0x29d   :  { %9246 = vmatmul.mubr.f32.vlgmr.msra.gmra.mrb[4].mxu0 %v2900_v39  ;;  %v3804_v39 = vand.u32 4294901760, %v3796_v34 }
 0x29e   :  { %9916 = vmatpush3.bf16.msra.mxu0 %v9906_v43  ;;  %9252 = vmatprep.mubr.msk.f32.mxu0 %vm10639_vm2, %v10640_v45 }
 0x29f   :  { %9917 = vmatprep.subr.bf16.mxu0 %v10638_v32  ;;  %v11235_v42 = vpack.c.bf16 %v3804_v39, %v3801_v37  ;;  %v3886_v9 = vsub.f32 %v3796_v34, %v3804_v39 }
 0x2a1   :  { %v3887_v61 = vand.u32 4294901760, %v3886_v9 }
 0x2a5   :  { %9253 = vmatmul.mubr.f32.vlgmr.msra.gmra.mrb[4].mxu0 %v2901_v44  ;;  %v3793_v44 = vld [vmem:[#allocation11] sm:$0x3] }
 0x2a6   :  { %9919 = vmatpush3.bf16.msra.mxu0 %v9918_v52  ;;  %9259 = vmatprep.mubr.msk.f32.mxu0 %vm10639_vm2, %v10640_v45  ;;  %v3888_v52 = vsub.f32 %v3886_v9, %v3887_v61 }
 0x2a7   :  { %9920 = vmatprep.subr.bf16.mxu0 %v10638_v32 }
 0x2ad   :  { %9260 = vmatmul.mubr.f32.vlgmr.msra.gmra.mrb[4].mxu0 %v2899_v35 }
 0x2ae   :  { %9922 = vmatpush3.bf16.msra.mxu0 %v9906_v43  ;;  %9266 = vmatprep.mubr.msk.f32.mxu0 %vm10639_vm2, %v10640_v45  ;;  %v3798_v43 = vsel %vm2828_vm4, %v3793_v44, 0 }
 0x2af   :  { %9923 = vmatprep.subr.bf16.mxu0 %v10638_v32  ;;  %v3867_v46 = vand.u32 4294901760, %v3798_v43 }
 0x2b1   :  { %v3868_v14 = vsub.f32 %v3798_v43, %v3867_v46 }
 0x2b3   :  { %v3869_v50 = vand.u32 4294901760, %v3868_v14 }
 0x2b5   :  { %9267 = vmatmul.mubr.f32.vlgmr.msra.gmra.mrb[4].mxu0 %v2899_v35 }
 0x2b6   :  { %9273 = vmatprep.mubr.msk.f32.mxu0 %vm10639_vm2, %v10640_v45  ;;  %9925 = vmatpush3.bf16.msra.mxu0 %v9924_v58 }
 0x2b7   :  { %9977 = vmatprep.subr.bf16.mxu0 %v10638_v32 }
 0x355   :  { %v9094_v53 = vpop.f32.mrb[0].mxu1 }
 0x356   :  { %v11204_v54 = vadd.f32 %v9094_v53, %v11113_v4  ;;  %v1806_v55 = vpop.f32.mrb[1].mxu1  ;;  %v3870_v53 = vsub.f32 %v3868_v14, %v3869_v50 }
 0x357   :  { %v11207_v56 = vadd.f32 %v1806_v55, %v11115_v5  ;;  %v3882_v55 = vand.u32 4294901760, %v3881_v51 }
 0x388   :  { %v3287_v59 = vpop.f32.mrb[4].mxu0 }
 0x389   :  { %v10105_v60 = vadd.f32 %v8512_v57, %v3287_v59  ;;  %v9268_v62 = vpop.f32.mrb[5].mxu0  ;;  %v3889_v57 = vand.u32 4294901760, %v3888_v52  ;;  %v3871_v59 = vand.u32 4294901760, %v3870_v53 }
 0x38a   :  { %v11261_v62 = vpack.c.bf16 %v3886_v9, %v3879_v47 }
 0x38b   :  { %10304 = vtanh.f32 %v10105_v60  ;;  %v8513_v16 = vmul.f32 -1.442695, %v10105_v60  ;;  %v11254_v60 = vpack.c.bf16 %v3889_v57, %v3882_v55 }
 0x38d   :  { %10306 = vpow2.f32 %v8513_v16 }
 0x395   :  { %v10305_v63 = vpop.eup %10304 }
 0x396   :  { %3305 = vrot.lane.b32.xlu1 %v10305_v63, %s10641_s30  ;;  %v11271_v63 = vpack.c.bf16 %v3887_v61, %v3880_v48 }
 0x397   :  { %v10307_v17 = vpop.eup %10306 }
 0x398   :  { %v3295_v4 = vadd.f32 1.0, %v10307_v17  ;;  %v8511_v17 = vld [vmem:[%s11645_s5] ss:$0 sm:$0xff] }
 0x39a   :  { %3300 = vrot.lane.b32.xlu1 %v2825_v0, %s10642_s18  ;;  %10308 = vrcp.f32 %v3295_v4  ;;  %v11291_v4 = vadd.f32 %v11207_v56, %v8511_v17 }
 0x3a4   :  { %v10309_v5 = vpop.eup %10308 }
 0x408   :  { %v3306_v49 = vpop.permute.xlu1 %3305 }
 0x409   :  { %v3308_v1 = vmul.f32 %v10309_v5, %v3306_v49  ;;  %v11294_v49 = vadd.f32 %v11204_v54, %v8511_v17 }
 0x40b   :  { %3310 = vrot.lane.b32.xlu0 %v3308_v1, %s10642_s18 }
 0x40c   :  { %v3301_v10 = vpop.permute.xlu1 %3300 }
 0x40d   :  { %v3303_v12 = vmul.f32 %v10309_v5, %v3301_v10 }
 0x47d   :  { %v3311_v19 = vpop.permute.xlu0 %3310 }
 0x47e   :  { %v3313_v21 = vadd.f32 %v3311_v19, %v3303_v12 }
 0x480   :  { %10310 = vtanh.f32 %v3313_v21 }
 0x48a   :  { %v10311_v23 = vpop.eup %10310 }
 0x48b   :  { %3316 = vrot.lane.b32.xlu1 %v10311_v23, %s10631_s7  ;;  %v3794_v23 = vld [vmem:[#allocation13] sm:$0x3] }
 0x48c   :  { %v4280_v56 = vrot.slane %v3794_v23, 1 }
 0x4fd   :  { %v3317_v27 = vpop.permute.xlu1 %3316 }
 0x4fe   :  { %v3319_v28 = vmul.f32 %v10309_v5, %v3317_v27 }
 0x500   :  { %3330 = vrot.lane.b32.xlu0 %v3319_v28, %s10643_s13 }
 0x572   :  { %v3331_v29 = vpop.permute.xlu0 %3330 }
 0x573   :  { %v3332_v6 = vsel %vm2828_vm4, %v3331_v29, 0 }
 0x574   :  { %v3401_v30 = vand.u32 4294901760, %v3332_v6 }
 0x576   :  { %v3402_v31 = vsub.f32 %v3332_v6, %v3401_v30  ;;  %9281 = vmatmul.mubr.f32.vlgmr.msra.gmra.mrb[2].mxu1 %v3401_v30 }
 0x577   :  { %9931 = vmatpush3.bf16.msra.mxu1 %v9930_v26  ;;  %9287 = vmatprep.mubr.msk.f32.mxu1 %vm10639_vm2, %v10640_v45 }
 0x578   :  { %v3403_v35 = vand.u32 4294901760, %v3402_v31  ;;  %9932 = vmatprep.subr.bf16.mxu1 %v10638_v32 }
 0x57a   :  { %v3404_v36 = vsub.f32 %v3402_v31, %v3403_v35 }
 0x57c   :  { %v3405_v40 = vand.u32 4294901760, %v3404_v36 }
 0x57e   :  { %9274 = vmatmul.mubr.f32.vlgmr.msra.gmra.mrb[6].mxu0 %v3405_v40  ;;  %9288 = vmatmul.mubr.f32.vlgmr.msra.gmra.mrb[2].mxu1 %v3402_v31 }
 0x57f   :  { %9934 = vmatpush3.bf16.msra.mxu1 %v9924_v58  ;;  %9294 = vmatprep.mubr.msk.f32.mxu1 %vm10639_vm2, %v10640_v45 }
 0x580   :  { %9935 = vmatprep.subr.bf16.mxu1 %v10638_v32  ;;  %9979 = vmatpush3.bf16.msra.mxu0 %v11235_v42 }
 0x581   :  { %9399 = vmatprep.mubr.msk.f32.mxu0 %vm10639_vm2, %v10640_v45  ;;  %9980 = vmatprep.subr.bf16.mxu0 %v10638_v32 }
 0x586   :  { %9295 = vmatmul.mubr.f32.vlgmr.msra.gmra.mrb[2].mxu1 %v3403_v35 }
 0x587   :  { %9937 = vmatpush3.bf16.msra.mxu1 %v9936_v38  ;;  %9301 = vmatprep.mubr.msk.f32.mxu1 %vm10639_vm2, %v10640_v45 }
 0x588   :  { %9938 = vmatprep.subr.bf16.mxu1 %v10638_v32 }
 0x58e   :  { %9302 = vmatmul.mubr.f32.vlgmr.msra.gmra.mrb[2].mxu1 %v3401_v30 }
 0x58f   :  { %9940 = vmatpush3.bf16.msra.mxu1 %v9924_v58  ;;  %9308 = vmatprep.mubr.msk.f32.mxu1 %vm10639_vm2, %v10640_v45 }
 0x590   :  { %9941 = vmatprep.subr.bf16.mxu1 %v10638_v32 }
 0x596   :  { %9309 = vmatmul.mubr.f32.vlgmr.msra.gmra.mrb[2].mxu1 %v3401_v30 }
 0x597   :  { %9943 = vmatpush3.bf16.msra.mxu1 %v11235_v42  ;;  %9315 = vmatprep.mubr.msk.f32.mxu1 %vm10639_vm2, %v10640_v45 }
 0x598   :  { %9944 = vmatprep.subr.bf16.mxu1 %v10638_v32 }
 0x59a   :  { %9316 = vmatmul.mubr.f32.vlgmr.msra.gmra.mrb[4].mxu1 %v3871_v59 }
 0x59b   :  { %9946 = vmatpush3.bf16.msra.mxu1 %v11254_v60  ;;  %9322 = vmatprep.mubr.msk.f32.mxu1 %vm10639_vm2, %v10640_v45 }
 0x59c   :  { %9947 = vmatprep.subr.bf16.mxu1 %v10638_v32 }
 0x5a2   :  { %9323 = vmatmul.mubr.f32.vlgmr.msra.gmra.mrb[4].mxu1 %v3867_v46 }
 0x5a3   :  { %9949 = vmatpush3.bf16.msra.mxu1 %v11261_v62  ;;  %9329 = vmatprep.mubr.msk.f32.mxu1 %vm10639_vm2, %v10640_v45 }
 0x5a4   :  { %9950 = vmatprep.subr.bf16.mxu1 %v10638_v32 }
 0x5aa   :  { %9330 = vmatmul.mubr.f32.vlgmr.msra.gmra.mrb[4].mxu1 %v3868_v14 }
 0x5ab   :  { %9952 = vmatpush3.bf16.msra.mxu1 %v11235_v42  ;;  %9336 = vmatprep.mubr.msk.f32.mxu1 %vm10639_vm2, %v10640_v45 }
 0x5ac   :  { %9953 = vmatprep.subr.bf16.mxu1 %v10638_v32 }
 0x5b2   :  { %9337 = vmatmul.mubr.f32.vlgmr.msra.gmra.mrb[4].mxu1 %v3869_v50 }
 0x5b3   :  { %9955 = vmatpush3.bf16.msra.mxu1 %v11271_v63  ;;  %9343 = vmatprep.mubr.msk.f32.mxu1 %vm10639_vm2, %v10640_v45 }
 0x5b4   :  { %9956 = vmatprep.subr.bf16.mxu1 %v10638_v32 }
 0x5ba   :  { %9344 = vmatmul.mubr.f32.vlgmr.msra.gmra.mrb[4].mxu1 %v3867_v46 }
 0x5bb   :  { %9958 = vmatpush3.bf16.msra.mxu1 %v11235_v42  ;;  %9350 = vmatprep.mubr.msk.f32.mxu1 %vm10639_vm2, %v10640_v45 }
 0x5bc   :  { %9959 = vmatprep.subr.bf16.mxu1 %v10638_v32 }
 0x5c2   :  { %9351 = vmatmul.mubr.f32.vlgmr.msra.gmra.mrb[4].mxu1 %v3867_v46 }
 0x5c3   :  { %9961 = vmatpush3.bf16.msra.mxu1 %v11235_v42  ;;  %9357 = vmatprep.mubr.msk.f32.mxu1 %vm10639_vm2, %v10640_v45 }
 0x5c4   :  { %9962 = vmatprep.subr.bf16.mxu1 %v10638_v32 }
 0x651   :  { %v11285_v0 = vpop.f32.mrb[6].mxu0 }
 0x652   :  { %v9275_v16 = vpop.f32.mrb[7].mxu0 }
 0x695   :  { %v4255_v5 = vpop.f32.mrb[4].mxu1 }
 0x696   :  { %v4260_v1 = vrot.slane %v4255_v5, 1  ;;  %v4263_v10 = vadd.f32 %v4255_v5, %v11291_v4  ;;  %v9352_v12 = vpop.f32.mrb[5].mxu1 }
 0x698   :  { %v4264_v19 = vadd.f32 %v4260_v1, %v11294_v49  ;;  %10312 = vtanh.f32 %v4263_v10  ;;  %v8515_v54 = vmul.f32 -1.442695, %v4263_v10 }
 0x69a   :  { %10314 = vtanh.f32 %v4264_v19  ;;  %v8516_v25 = vmul.f32 -1.442695, %v4264_v19 }
 0x69b   :  { %10316 = vpow2.f32 %v8515_v54 }
 0x69c   :  { %10318 = vpow2.f32 %v8516_v25 }
 0x6a2   :  { %v10313_v21 = vpop.eup %10312 }
 0x6a3   :  { %4291 = vrot.lane.b32.xlu0 %v10313_v21, %s10641_s30 }
 0x6a4   :  { %v10315_v24 = vpop.eup %10314 }
 0x6a5   :  { %4293 = vrot.lane.b32.xlu1 %v10315_v24, %s10641_s30  ;;  %v10317_v3 = vpop.eup %10316 }
 0x6a6   :  { %v10319_v41 = vpop.eup %10318  ;;  %v4271_v11 = vadd.f32 1.0, %v10317_v3 }
 0x6a7   :  { %4281 = vrot.lane.b32.xlu0 %v3794_v23, %s10642_s18  ;;  %v4272_v13 = vadd.f32 1.0, %v10319_v41 }
 0x6a8   :  { %10320 = vrcp.f32 %v4271_v11 }
 0x6a9   :  { %4283 = vrot.lane.b32.xlu1 %v4280_v56, %s10642_s18  ;;  %10322 = vrcp.f32 %v4272_v13 }
 0x6b2   :  { %v10321_v7 = vpop.eup %10320 }
 0x6b3   :  { %v10323_v20 = vpop.eup %10322 }
 0x715   :  { %v4292_v15 = vpop.permute.xlu0 %4291 }
 0x716   :  { %v4297_v18 = vmul.f32 %v10321_v7, %v4292_v15 }
 0x717   :  { %v4294_v22 = vpop.permute.xlu1 %4293 }
 0x718   :  { %4301 = vrot.lane.b32.xlu0 %v4297_v18, %s10642_s18  ;;  %v4298_v8 = vmul.f32 %v10323_v20, %v4294_v22 }
 0x719   :  { %v4282_v2 = vpop.permute.xlu0 %4281 }
 0x71a   :  { %4303 = vrot.lane.b32.xlu1 %v4298_v8, %s10642_s18  ;;  %v4287_v26 = vmul.f32 %v10321_v7, %v4282_v2 }
 0x71b   :  { %v4284_v58 = vpop.permute.xlu1 %4283 }
 0x71c   :  { %v4288_v38 = vmul.f32 %v10323_v20, %v4284_v58 }
 0x78a   :  { %v4302_v27 = vpop.permute.xlu0 %4301 }
 0x78b   :  { %v11304_v28 = vadd.f32 %v4302_v27, %v4287_v26 }
 0x78c   :  { %v4304_v29 = vpop.permute.xlu1 %4303 }
 0x78d   :  { %10324 = vtanh.f32 %v11304_v28  ;;  %v11307_v6 = vadd.f32 %v4304_v29, %v4288_v38  ;;  %v4810_v25 = vrot.slane %v11304_v28, 7 }
 0x78f   :  { %10326 = vtanh.f32 %v11307_v6  ;;  %v4811_v56 = vrot.slane %v11307_v6, 7 }
 0x797   :  { %v10325_v30 = vpop.eup %10324 }
 0x798   :  { %4313 = vrot.lane.b32.xlu0 %v10325_v30, %s10631_s7 }
 0x799   :  { %v10327_v31 = vpop.eup %10326 }
 0x79a   :  { %4315 = vrot.lane.b32.xlu1 %v10327_v31, %s10631_s7 }
 0x80a   :  { %v4314_v33 = vpop.permute.xlu0 %4313 }
 0x80b   :  { %v4319_v36 = vmul.f32 %v10321_v7, %v4314_v33 }
 0x80c   :  { %v4316_v34 = vpop.permute.xlu1 %4315 }
 0x80d   :  { %v4320_v35 = vmul.f32 %v10323_v20, %v4316_v34 }
 0x80f   :  { %v4323_v37 = vrot.slane %v4320_v35, 7 }
 0x811   :  { %v4324_v39 = vsel %vm1835_vm1, %v4323_v37, %v4319_v36 }
 0x812   :  { %4325 = vrot.lane.b32.xlu1 %v4324_v39, %s10643_s13 }
 0x884   :  { %v4326_v40 = vpop.permute.xlu1 %4325 }
 0x885   :  { %v4327_v44 = vsel %vm2828_vm4, %v4326_v40, 0 }
 0x886   :  { %v4396_v43 = vand.u32 4294901760, %v4327_v44 }
 0x888   :  { %v4397_v46 = vsub.f32 %v4327_v44, %v4396_v43 }
 0x88a   :  { %v4398_v47 = vand.u32 4294901760, %v4397_v46 }
 0x88c   :  { %v4399_v9 = vsub.f32 %v4397_v46, %v4398_v47 }
 0x88e   :  { %v4400_v14 = vand.u32 4294901760, %v4399_v9 }
 0x890   :  { %9358 = vmatmul.mubr.f32.vlgmr.msra.gmra.mrb[6].mxu1 %v4400_v14 }
 0x891   :  { %9964 = vmatpush3.bf16.msra.mxu1 %v11254_v60  ;;  %9364 = vmatprep.mubr.msk.f32.mxu1 %vm10639_vm2, %v10640_v45 }
 0x892   :  { %9965 = vmatprep.subr.bf16.mxu1 %v10638_v32 }
 0x898   :  { %9365 = vmatmul.mubr.f32.vlgmr.msra.gmra.mrb[6].mxu1 %v4396_v43 }
 0x899   :  { %9967 = vmatpush3.bf16.msra.mxu1 %v11261_v62  ;;  %9371 = vmatprep.mubr.msk.f32.mxu1 %vm10639_vm2, %v10640_v45 }
 0x89a   :  { %9968 = vmatprep.subr.bf16.mxu1 %v10638_v32 }
 0x8a0   :  { %9372 = vmatmul.mubr.f32.vlgmr.msra.gmra.mrb[6].mxu1 %v4397_v46 }
 0x8a1   :  { %9970 = vmatpush3.bf16.msra.mxu1 %v11235_v42  ;;  %9378 = vmatprep.mubr.msk.f32.mxu1 %vm10639_vm2, %v10640_v45 }
 0x8a2   :  { %9971 = vmatprep.subr.bf16.mxu1 %v10638_v32 }
 0x8a8   :  { %9379 = vmatmul.mubr.f32.vlgmr.msra.gmra.mrb[6].mxu1 %v4398_v47 }
 0x8a9   :  { %9973 = vmatpush3.bf16.msra.mxu1 %v11271_v63  ;;  %9385 = vmatprep.mubr.msk.f32.mxu1 %vm10639_vm2, %v10640_v45 }
 0x8aa   :  { %9974 = vmatprep.subr.bf16.mxu1 %v10638_v32 }
 0x8b0   :  { %9386 = vmatmul.mubr.f32.vlgmr.msra.gmra.mrb[6].mxu1 %v4396_v43 }
 0x8b1   :  { %9976 = vmatpush3.bf16.msra.mxu1 %v11235_v42  ;;  %9392 = vmatprep.mubr.msk.f32.mxu1 %vm10639_vm2, %v10640_v45 }
 0x8b2   :  { %9995 = vmatprep.subr.bf16.mxu1 %v10638_v32 }
 0x8b8   :  { %9393 = vmatmul.mubr.f32.vlgmr.msra.gmra.mrb[6].mxu1 %v4396_v43 }
 0x8b9   :  { %9997 = vmatpush3.bf16.msra.mxu1 %v11235_v42  ;;  %9441 = vmatprep.mubr.msk.f32.mxu1 %vm10639_vm2, %v10640_v45 }
 0x8ba   :  { %9998 = vmatprep.subr.bf16.mxu1 %v10638_v32 }
 0x98b   :  { %v4784_v48 = vpop.f32.mrb[6].mxu1 }
 0x98c   :  { %v4789_v61 = vrot.slane %v4784_v48, 7  ;;  %v4793_v50 = vadd.f32 %v4784_v48, %v11294_v49  ;;  %v9394_v51 = vpop.f32.mrb[7].mxu1 }
 0x98e   :  { %v4792_v52 = vadd.f32 %v4789_v61, %v11291_v4  ;;  %10328 = vtanh.f32 %v4793_v50  ;;  %v8518_v57 = vmul.f32 -1.442695, %v4793_v50 }
 0x990   :  { %10330 = vtanh.f32 %v4792_v52  ;;  %v8517_v59 = vmul.f32 -1.442695, %v4792_v52 }
 0x991   :  { %10332 = vpow2.f32 %v8518_v57 }
 0x992   :  { %10334 = vpow2.f32 %v8517_v59 }
 0x998   :  { %v10329_v53 = vpop.eup %10328 }
 0x999   :  { %4820 = vrot.lane.b32.xlu1 %v10329_v53, %s10641_s30 }
 0x99a   :  { %v10331_v55 = vpop.eup %10330 }
 0x99b   :  { %4818 = vrot.lane.b32.xlu0 %v10331_v55, %s10641_s30  ;;  %v10333_v16 = vpop.eup %10332 }
 0x99c   :  { %v10335_v17 = vpop.eup %10334  ;;  %v4801_v5 = vadd.f32 1.0, %v10333_v16 }
 0x99d   :  { %v4800_v1 = vadd.f32 1.0, %v10335_v17 }
 0x99e   :  { %10336 = vrcp.f32 %v4801_v5 }
 0x99f   :  { %10338 = vrcp.f32 %v4800_v1 }
 0x9a8   :  { %v10337_v10 = vpop.eup %10336 }
 0x9a9   :  { %v10339_v21 = vpop.eup %10338  ;;  %v4815_v54 = vmul.f32 %v10337_v10, %v4811_v56 }
 0x9aa   :  { %v4814_v11 = vmul.f32 %v10339_v21, %v4810_v25 }
 0xa0b   :  { %v4821_v12 = vpop.permute.xlu1 %4820 }
 0xa0c   :  { %v4825_v19 = vmul.f32 %v10337_v10, %v4821_v12 }
 0xa0d   :  { %v4819_v23 = vpop.permute.xlu0 %4818 }
 0xa0e   :  { %4830 = vrot.lane.b32.xlu1 %v4825_v19, %s10642_s18  ;;  %v4824_v24 = vmul.f32 %v10339_v21, %v4819_v23 }
 0xa10   :  { %4828 = vrot.lane.b32.xlu0 %v4824_v24, %s10642_s18 }
 0xa80   :  { %v4831_v3 = vpop.permute.xlu1 %4830 }
 0xa81   :  { %v11347_v41 = vadd.f32 %v4831_v3, %v4815_v54 }
 0xa82   :  { %v4829_v13 = vpop.permute.xlu0 %4828 }
 0xa83   :  { %10340 = vtanh.f32 %v11347_v41  ;;  %v11350_v7 = vadd.f32 %v4829_v13, %v4814_v11  ;;  %v5339_v59 = vrot.slane %v11347_v41, 7 }
 0xa85   :  { %10342 = vtanh.f32 %v11350_v7  ;;  %v5338_v57 = vrot.slane %v11350_v7, 7 }
 0xa8d   :  { %v10341_v15 = vpop.eup %10340 }
 0xa8e   :  { %4842 = vrot.lane.b32.xlu1 %v10341_v15, %s10631_s7 }
 0xa8f   :  { %v10343_v18 = vpop.eup %10342 }
 0xa90   :  { %4840 = vrot.lane.b32.xlu0 %v10343_v18, %s10631_s7 }
 0xb00   :  { %v4843_v20 = vpop.permute.xlu1 %4842 }
 0xb01   :  { %v4847_v2 = vmul.f32 %v10337_v10, %v4843_v20 }
 0xb02   :  { %v4841_v22 = vpop.permute.xlu0 %4840 }
 0xb03   :  { %v4846_v8 = vmul.f32 %v10339_v21, %v4841_v22 }
 0xb05   :  { %v4850_v26 = vrot.slane %v4846_v8, 1 }
 0xb07   :  { %v4851_v58 = vsel %vm1835_vm1, %v4847_v2, %v4850_v26 }
 0xb08   :  { %4852 = vrot.lane.b32.xlu0 %v4851_v58, %s10643_s13 }
 0xb7a   :  { %v4853_v27 = vpop.permute.xlu0 %4852 }
 0xb7b   :  { %v4854_v28 = vsel %vm2828_vm4, %v4853_v27, 0 }
 0xb7c   :  { %v4923_v38 = vand.u32 4294901760, %v4854_v28 }
 0xb7e   :  { %v4924_v29 = vsub.f32 %v4854_v28, %v4923_v38 }
 0xb80   :  { %v4925_v6 = vand.u32 4294901760, %v4924_v29 }
 0xb82   :  { %v4926_v30 = vsub.f32 %v4924_v29, %v4925_v6 }
 0xb84   :  { %v4927_v31 = vand.u32 4294901760, %v4926_v30 }
 0xb86   :  { %9400 = vmatmul.mubr.f32.vlgmr.msra.gmra.mrb[8].mxu0 %v4927_v31 }
 0xb87   :  { %9982 = vmatpush3.bf16.msra.mxu0 %v11254_v60  ;;  %9406 = vmatprep.mubr.msk.f32.mxu0 %vm10639_vm2, %v10640_v45 }
 0xb88   :  { %9983 = vmatprep.subr.bf16.mxu0 %v10638_v32 }
 0xb8e   :  { %9407 = vmatmul.mubr.f32.vlgmr.msra.gmra.mrb[8].mxu0 %v4923_v38 }
 0xb8f   :  { %9985 = vmatpush3.bf16.msra.mxu0 %v11261_v62  ;;  %9413 = vmatprep.mubr.msk.f32.mxu0 %vm10639_vm2, %v10640_v45 }
 0xb90   :  { %9986 = vmatprep.subr.bf16.mxu0 %v10638_v32 }
 0xb96   :  { %9414 = vmatmul.mubr.f32.vlgmr.msra.gmra.mrb[8].mxu0 %v4924_v29 }
 0xb97   :  { %9988 = vmatpush3.bf16.msra.mxu0 %v11235_v42  ;;  %9420 = vmatprep.mubr.msk.f32.mxu0 %vm10639_vm2, %v10640_v45 }
 0xb98   :  { %9989 = vmatprep.subr.bf16.mxu0 %v10638_v32 }
 0xb9e   :  { %9421 = vmatmul.mubr.f32.vlgmr.msra.gmra.mrb[8].mxu0 %v4925_v6 }
 0xb9f   :  { %9991 = vmatpush3.bf16.msra.mxu0 %v11271_v63  ;;  %9427 = vmatprep.mubr.msk.f32.mxu0 %vm10639_vm2, %v10640_v45 }
 0xba0   :  { %9992 = vmatprep.subr.bf16.mxu0 %v10638_v32 }
 0xba6   :  { %9428 = vmatmul.mubr.f32.vlgmr.msra.gmra.mrb[8].mxu0 %v4923_v38 }
 0xba7   :  { %9994 = vmatpush3.bf16.msra.mxu0 %v11235_v42  ;;  %9434 = vmatprep.mubr.msk.f32.mxu0 %vm10639_vm2, %v10640_v45 }
 0xba8   :  { %10013 = vmatprep.subr.bf16.mxu0 %v10638_v32 }
 0xbae   :  { %9435 = vmatmul.mubr.f32.vlgmr.msra.gmra.mrb[8].mxu0 %v4923_v38 }
 0xbaf   :  { %10015 = vmatpush3.bf16.msra.mxu0 %v11235_v42  ;;  %9483 = vmatprep.mubr.msk.f32.mxu0 %vm10639_vm2, %v10640_v45 }
 0xbb0   :  { %10016 = vmatprep.subr.bf16.mxu0 %v10638_v32 }
 0xc81   :  { %v5311_v33 = vpop.f32.mrb[8].mxu0 }
 0xc82   :  { %v5316_v34 = vrot.slane %v5311_v33, 6  ;;  %v5317_v35 = vrot.slane %v5311_v33, 7  ;;  %v9436_v36 = vpop.f32.mrb[9].mxu0 }
 0xc84   :  { %v5320_v37 = vadd.f32 %v5316_v34, %v11291_v4  ;;  %v5321_v39 = vadd.f32 %v5317_v35, %v11294_v49 }
 0xc86   :  { %10344 = vtanh.f32 %v5320_v37  ;;  %v8519_v43 = vmul.f32 -1.442695, %v5320_v37  ;;  %v8520_v46 = vmul.f32 -1.442695, %v5321_v39 }
 0xc87   :  { %10346 = vtanh.f32 %v5321_v39 }
 0xc88   :  { %10348 = vpow2.f32 %v8519_v43 }
 0xc89   :  { %10350 = vpow2.f32 %v8520_v46 }
 0xc90   :  { %v10345_v40 = vpop.eup %10344 }
 0xc91   :  { %v10347_v44 = vpop.eup %10346  ;;  %5346 = vrot.lane.b32.xlu1 %v10345_v40, %s10641_s30 }
 0xc92   :  { %5348 = vrot.lane.b32.xlu0 %v10347_v44, %s10641_s30  ;;  %v10349_v47 = vpop.eup %10348 }
 0xc93   :  { %v10351_v9 = vpop.eup %10350  ;;  %v5328_v14 = vadd.f32 1.0, %v10349_v47 }
 0xc94   :  { %v5329_v48 = vadd.f32 1.0, %v10351_v9 }
 0xc95   :  { %10352 = vrcp.f32 %v5328_v14 }
 0xc96   :  { %10354 = vrcp.f32 %v5329_v48 }
 0xc9f   :  { %v10353_v61 = vpop.eup %10352 }
 0xca0   :  { %v10355_v51 = vpop.eup %10354  ;;  %v5342_v16 = vmul.f32 %v10353_v61, %v5338_v57 }
 0xca1   :  { %v5343_v17 = vmul.f32 %v10355_v51, %v5339_v59 }
 0xd03   :  { %v5347_v50 = vpop.permute.xlu1 %5346 }
 0xd04   :  { %v5349_v52 = vpop.permute.xlu0 %5348  ;;  %v5352_v53 = vmul.f32 %v10353_v61, %v5347_v50 }
 0xd05   :  { %v5353_v55 = vmul.f32 %v10355_v51, %v5349_v52 }
 0xd06   :  { %5356 = vrot.lane.b32.xlu1 %v5352_v53, %s10642_s18 }
 0xd07   :  { %5358 = vrot.lane.b32.xlu0 %v5353_v55, %s10642_s18 }
 0xd78   :  { %v5357_v5 = vpop.permute.xlu1 %5356 }
 0xd79   :  { %v5359_v1 = vpop.permute.xlu0 %5358  ;;  %v11390_v10 = vadd.f32 %v5357_v5, %v5342_v16 }
 0xd7a   :  { %v11392_v12 = vadd.f32 %v5359_v1, %v5343_v17 }
 0xd7b   :  { %10356 = vtanh.f32 %v11390_v10  ;;  %v5867_v46 = vrot.slane %v11390_v10, 7 }
 0xd7c   :  { %10358 = vtanh.f32 %v11392_v12  ;;  %v5868_v47 = vrot.slane %v11392_v12, 7 }
 0xd85   :  { %v10357_v19 = vpop.eup %10356 }
 0xd86   :  { %v10359_v21 = vpop.eup %10358  ;;  %5368 = vrot.lane.b32.xlu1 %v10357_v19, %s10631_s7 }
 0xd87   :  { %5370 = vrot.lane.b32.xlu0 %v10359_v21, %s10631_s7 }
 0xdf8   :  { %v5369_v23 = vpop.permute.xlu1 %5368 }
 0xdf9   :  { %v5371_v24 = vpop.permute.xlu0 %5370  ;;  %v5374_v56 = vmul.f32 %v10353_v61, %v5369_v23 }
 0xdfa   :  { %v5375_v54 = vmul.f32 %v10355_v51, %v5371_v24 }
 0xdfb   :  { %v5378_v25 = vrot.slane %v5374_v56, 2 }
 0xdfc   :  { %v5379_v3 = vrot.slane %v5375_v54, 1 }
 0xdfe   :  { %v5380_v41 = vsel %vm1835_vm1, %v5379_v3, %v5378_v25 }
 0xdff   :  { %5381 = vrot.lane.b32.xlu1 %v5380_v41, %s10643_s13 }
 0xe71   :  { %v5382_v11 = vpop.permute.xlu1 %5381 }
 0xe72   :  { %v5383_v13 = vsel %vm2828_vm4, %v5382_v11, 0 }
 0xe73   :  { %v5452_v7 = vand.u32 4294901760, %v5383_v13 }
 0xe75   :  { %v5453_v15 = vsub.f32 %v5383_v13, %v5452_v7 }
 0xe77   :  { %v5454_v18 = vand.u32 4294901760, %v5453_v15 }
 0xe79   :  { %v5455_v20 = vsub.f32 %v5453_v15, %v5454_v18 }
 0xe7b   :  { %v5456_v22 = vand.u32 4294901760, %v5455_v20 }
 0xe7d   :  { %9442 = vmatmul.mubr.f32.vlgmr.msra.gmra.mrb[8].mxu1 %v5456_v22 }
 0xe7e   :  { %10000 = vmatpush3.bf16.msra.mxu1 %v11254_v60  ;;  %9448 = vmatprep.mubr.msk.f32.mxu1 %vm10639_vm2, %v10640_v45 }
 0xe7f   :  { %10001 = vmatprep.subr.bf16.mxu1 %v10638_v32 }
 0xe85   :  { %9449 = vmatmul.mubr.f32.vlgmr.msra.gmra.mrb[8].mxu1 %v5452_v7 }
 0xe86   :  { %10003 = vmatpush3.bf16.msra.mxu1 %v11261_v62  ;;  %9455 = vmatprep.mubr.msk.f32.mxu1 %vm10639_vm2, %v10640_v45 }
 0xe87   :  { %10004 = vmatprep.subr.bf16.mxu1 %v10638_v32 }
 0xe8d   :  { %9456 = vmatmul.mubr.f32.vlgmr.msra.gmra.mrb[8].mxu1 %v5453_v15 }
 0xe8e   :  { %10006 = vmatpush3.bf16.msra.mxu1 %v11235_v42  ;;  %9462 = vmatprep.mubr.msk.f32.mxu1 %vm10639_vm2, %v10640_v45 }
 0xe8f   :  { %10007 = vmatprep.subr.bf16.mxu1 %v10638_v32 }
 0xe95   :  { %9463 = vmatmul.mubr.f32.vlgmr.msra.gmra.mrb[8].mxu1 %v5454_v18 }
 0xe96   :  { %10009 = vmatpush3.bf16.msra.mxu1 %v11271_v63  ;;  %9469 = vmatprep.mubr.msk.f32.mxu1 %vm10639_vm2, %v10640_v45 }
 0xe97   :  { %10010 = vmatprep.subr.bf16.mxu1 %v10638_v32 }
 0xe9d   :  { %9470 = vmatmul.mubr.f32.vlgmr.msra.gmra.mrb[8].mxu1 %v5452_v7 }
 0xe9e   :  { %10012 = vmatpush3.bf16.msra.mxu1 %v11235_v42  ;;  %9476 = vmatprep.mubr.msk.f32.mxu1 %vm10639_vm2, %v10640_v45 }
 0xe9f   :  { %10031 = vmatprep.subr.bf16.mxu1 %v10638_v32 }
 0xea5   :  { %9477 = vmatmul.mubr.f32.vlgmr.msra.gmra.mrb[8].mxu1 %v5452_v7 }
 0xea6   :  { %10033 = vmatpush3.bf16.msra.mxu1 %v11235_v42  ;;  %9525 = vmatprep.mubr.msk.f32.mxu1 %vm10639_vm2, %v10640_v45 }
 0xea7   :  { %10034 = vmatprep.subr.bf16.mxu1 %v10638_v32 }
 0xf78   :  { %v5840_v8 = vpop.f32.mrb[8].mxu1 }
 0xf79   :  { %v5845_v2 = vrot.slane %v5840_v8, 5  ;;  %v5846_v26 = vrot.slane %v5840_v8, 6  ;;  %v9478_v58 = vpop.f32.mrb[9].mxu1 }
 0xf7b   :  { %v5849_v27 = vadd.f32 %v5845_v2, %v11291_v4  ;;  %v5850_v28 = vadd.f32 %v5846_v26, %v11294_v49 }
 0xf7d   :  { %10360 = vtanh.f32 %v5849_v27  ;;  %v8521_v6 = vmul.f32 -1.442695, %v5849_v27  ;;  %v8522_v30 = vmul.f32 -1.442695, %v5850_v28 }
 0xf7e   :  { %10362 = vtanh.f32 %v5850_v28 }
 0xf7f   :  { %10364 = vpow2.f32 %v8521_v6 }
 0xf80   :  { %10366 = vpow2.f32 %v8522_v30 }
 0xf87   :  { %v10361_v38 = vpop.eup %10360 }
 0xf88   :  { %v10363_v29 = vpop.eup %10362  ;;  %5875 = vrot.lane.b32.xlu0 %v10361_v38, %s10641_s30 }
 0xf89   :  { %5877 = vrot.lane.b32.xlu1 %v10363_v29, %s10641_s30  ;;  %v10365_v31 = vpop.eup %10364 }
 0xf8a   :  { %v10367_v33 = vpop.eup %10366  ;;  %v5857_v34 = vadd.f32 1.0, %v10365_v31 }
 0xf8b   :  { %v5858_v35 = vadd.f32 1.0, %v10367_v33 }
 0xf8c   :  { %10368 = vrcp.f32 %v5857_v34 }
 0xf8d   :  { %10370 = vrcp.f32 %v5858_v35 }
 0xf96   :  { %v10369_v36 = vpop.eup %10368 }
 0xf97   :  { %v10371_v39 = vpop.eup %10370  ;;  %v5871_v9 = vmul.f32 %v10369_v36, %v5867_v46 }
 0xf98   :  { %v5872_v14 = vmul.f32 %v10371_v39, %v5868_v47 }
 0xffa   :  { %v5876_v37 = vpop.permute.xlu0 %5875 }
 0xffb   :  { %v5878_v40 = vpop.permute.xlu1 %5877  ;;  %v5881_v44 = vmul.f32 %v10369_v36, %v5876_v37 }
 0xffc   :  { %v5882_v43 = vmul.f32 %v10371_v39, %v5878_v40 }
 0xffd   :  { %5885 = vrot.lane.b32.xlu0 %v5881_v44, %s10642_s18 }
 0xffe   :  { %5887 = vrot.lane.b32.xlu1 %v5882_v43, %s10642_s18 }
0x106f   :  { %v5886_v48 = vpop.permute.xlu0 %5885 }
0x1070   :  { %v5888_v61 = vpop.permute.xlu1 %5887  ;;  %v11433_v50 = vadd.f32 %v5886_v48, %v5871_v9 }
0x1071   :  { %v11435_v51 = vadd.f32 %v5888_v61, %v5872_v14 }
0x1072   :  { %10372 = vtanh.f32 %v11433_v50  ;;  %v6396_v30 = vrot.slane %v11433_v50, 7 }
0x1073   :  { %10374 = vtanh.f32 %v11435_v51  ;;  %v6397_v31 = vrot.slane %v11435_v51, 7 }
0x107c   :  { %v10373_v52 = vpop.eup %10372 }
0x107d   :  { %v10375_v53 = vpop.eup %10374  ;;  %5897 = vrot.lane.b32.xlu0 %v10373_v52, %s10631_s7 }
0x107e   :  { %5899 = vrot.lane.b32.xlu1 %v10375_v53, %s10631_s7 }
0x10ef   :  { %v5898_v55 = vpop.permute.xlu0 %5897 }
0x10f0   :  { %v5900_v57 = vpop.permute.xlu1 %5899  ;;  %v5903_v59 = vmul.f32 %v10369_v36, %v5898_v55 }
0x10f1   :  { %v5904_v16 = vmul.f32 %v10371_v39, %v5900_v57 }
0x10f2   :  { %v5907_v17 = vrot.slane %v5903_v59, 3 }
0x10f3   :  { %v5908_v5 = vrot.slane %v5904_v16, 2 }
0x10f5   :  { %v5909_v1 = vsel %vm1835_vm1, %v5908_v5, %v5907_v17 }
0x10f6   :  { %5910 = vrot.lane.b32.xlu0 %v5909_v1, %s10643_s13 }
0x1168   :  { %v5911_v10 = vpop.permute.xlu0 %5910 }
0x1169   :  { %v5912_v12 = vsel %vm2828_vm4, %v5911_v10, 0 }
0x116a   :  { %v5981_v19 = vand.u32 4294901760, %v5912_v12 }
0x116c   :  { %v5982_v21 = vsub.f32 %v5912_v12, %v5981_v19 }
0x116e   :  { %v5983_v23 = vand.u32 4294901760, %v5982_v21 }
0x1170   :  { %v5984_v24 = vsub.f32 %v5982_v21, %v5983_v23 }
0x1172   :  { %v5985_v56 = vand.u32 4294901760, %v5984_v24 }
0x1174   :  { %9484 = vmatmul.mubr.f32.vlgmr.msra.gmra.mrb[10].mxu0 %v5985_v56 }
0x1175   :  { %10018 = vmatpush3.bf16.msra.mxu0 %v11254_v60  ;;  %9490 = vmatprep.mubr.msk.f32.mxu0 %vm10639_vm2, %v10640_v45 }
0x1176   :  { %10019 = vmatprep.subr.bf16.mxu0 %v10638_v32 }
0x117c   :  { %9491 = vmatmul.mubr.f32.vlgmr.msra.gmra.mrb[10].mxu0 %v5981_v19 }
0x117d   :  { %10021 = vmatpush3.bf16.msra.mxu0 %v11261_v62  ;;  %9497 = vmatprep.mubr.msk.f32.mxu0 %vm10639_vm2, %v10640_v45 }
0x117e   :  { %10022 = vmatprep.subr.bf16.mxu0 %v10638_v32 }
0x1184   :  { %9498 = vmatmul.mubr.f32.vlgmr.msra.gmra.mrb[10].mxu0 %v5982_v21 }
0x1185   :  { %10024 = vmatpush3.bf16.msra.mxu0 %v11235_v42  ;;  %9504 = vmatprep.mubr.msk.f32.mxu0 %vm10639_vm2, %v10640_v45 }
0x1186   :  { %10025 = vmatprep.subr.bf16.mxu0 %v10638_v32 }
0x118c   :  { %9505 = vmatmul.mubr.f32.vlgmr.msra.gmra.mrb[10].mxu0 %v5983_v23 }
0x118d   :  { %10027 = vmatpush3.bf16.msra.mxu0 %v11271_v63  ;;  %9511 = vmatprep.mubr.msk.f32.mxu0 %vm10639_vm2, %v10640_v45 }
0x118e   :  { %10028 = vmatprep.subr.bf16.mxu0 %v10638_v32 }
0x1194   :  { %9512 = vmatmul.mubr.f32.vlgmr.msra.gmra.mrb[10].mxu0 %v5981_v19 }
0x1195   :  { %10030 = vmatpush3.bf16.msra.mxu0 %v11235_v42  ;;  %9518 = vmatprep.mubr.msk.f32.mxu0 %vm10639_vm2, %v10640_v45 }
0x1196   :  { %10049 = vmatprep.subr.bf16.mxu0 %v10638_v32 }
0x119c   :  { %9519 = vmatmul.mubr.f32.vlgmr.msra.gmra.mrb[10].mxu0 %v5981_v19 }
0x119d   :  { %10051 = vmatpush3.bf16.msra.mxu0 %v11235_v42  ;;  %9567 = vmatprep.mubr.msk.f32.mxu0 %vm10639_vm2, %v10640_v45 }
0x119e   :  { %10052 = vmatprep.subr.bf16.mxu0 %v10638_v32 }
0x126f   :  { %v6369_v54 = vpop.f32.mrb[10].mxu0 }
0x1270   :  { %v6374_v25 = vrot.slane %v6369_v54, 4  ;;  %v6375_v3 = vrot.slane %v6369_v54, 5  ;;  %v9520_v41 = vpop.f32.mrb[11].mxu0 }
0x1272   :  { %v6378_v11 = vadd.f32 %v6374_v25, %v11291_v4  ;;  %v6379_v13 = vadd.f32 %v6375_v3, %v11294_v49 }
0x1274   :  { %10376 = vtanh.f32 %v6378_v11  ;;  %v8523_v18 = vmul.f32 -1.442695, %v6378_v11  ;;  %v8524_v20 = vmul.f32 -1.442695, %v6379_v13 }
0x1275   :  { %10378 = vtanh.f32 %v6379_v13 }
0x1276   :  { %10380 = vpow2.f32 %v8523_v18 }
0x1277   :  { %10382 = vpow2.f32 %v8524_v20 }
0x127e   :  { %v10377_v7 = vpop.eup %10376 }
0x127f   :  { %v10379_v15 = vpop.eup %10378  ;;  %6404 = vrot.lane.b32.xlu1 %v10377_v7, %s10641_s30 }
0x1280   :  { %6406 = vrot.lane.b32.xlu0 %v10379_v15, %s10641_s30  ;;  %v10381_v22 = vpop.eup %10380 }
0x1281   :  { %v10383_v8 = vpop.eup %10382  ;;  %v6386_v2 = vadd.f32 1.0, %v10381_v22 }
0x1282   :  { %v6387_v26 = vadd.f32 1.0, %v10383_v8 }
0x1283   :  { %10384 = vrcp.f32 %v6386_v2 }
0x1284   :  { %10386 = vrcp.f32 %v6387_v26 }
0x128d   :  { %v10385_v58 = vpop.eup %10384 }
0x128e   :  { %v10387_v28 = vpop.eup %10386  ;;  %v6400_v33 = vmul.f32 %v10385_v58, %v6396_v30 }
0x128f   :  { %v6401_v34 = vmul.f32 %v10387_v28, %v6397_v31 }
0x12f1   :  { %v6405_v27 = vpop.permute.xlu1 %6404 }
0x12f2   :  { %v6407_v38 = vpop.permute.xlu0 %6406  ;;  %v6410_v29 = vmul.f32 %v10385_v58, %v6405_v27 }
0x12f3   :  { %v6411_v6 = vmul.f32 %v10387_v28, %v6407_v38 }
0x12f4   :  { %6414 = vrot.lane.b32.xlu1 %v6410_v29, %s10642_s18 }
0x12f5   :  { %6416 = vrot.lane.b32.xlu0 %v6411_v6, %s10642_s18 }
0x1366   :  { %v6415_v35 = vpop.permute.xlu1 %6414 }
0x1367   :  { %v6417_v36 = vpop.permute.xlu0 %6416  ;;  %v11476_v37 = vadd.f32 %v6415_v35, %v6400_v33 }
0x1368   :  { %v11478_v39 = vadd.f32 %v6417_v36, %v6401_v34 }
0x1369   :  { %10388 = vtanh.f32 %v11476_v37  ;;  %v6925_v20 = vrot.slane %v11476_v37, 7 }
0x136a   :  { %10390 = vtanh.f32 %v11478_v39  ;;  %v6926_v22 = vrot.slane %v11478_v39, 7 }
0x1373   :  { %v10389_v40 = vpop.eup %10388 }
0x1374   :  { %v10391_v44 = vpop.eup %10390  ;;  %6426 = vrot.lane.b32.xlu1 %v10389_v40, %s10631_s7 }
0x1375   :  { %6428 = vrot.lane.b32.xlu0 %v10391_v44, %s10631_s7 }
0x13e6   :  { %v6427_v43 = vpop.permute.xlu1 %6426 }
0x13e7   :  { %v6429_v46 = vpop.permute.xlu0 %6428  ;;  %v6432_v47 = vmul.f32 %v10385_v58, %v6427_v43 }
0x13e8   :  { %v6433_v9 = vmul.f32 %v10387_v28, %v6429_v46 }
0x13e9   :  { %v6436_v14 = vrot.slane %v6432_v47, 4 }
0x13ea   :  { %v6437_v48 = vrot.slane %v6433_v9, 3 }
0x13ec   :  { %v6438_v61 = vsel %vm1835_vm1, %v6437_v48, %v6436_v14 }
0x13ed   :  { %6439 = vrot.lane.b32.xlu1 %v6438_v61, %s10643_s13 }
0x145f   :  { %v6440_v50 = vpop.permute.xlu1 %6439 }
0x1460   :  { %v6441_v51 = vsel %vm2828_vm4, %v6440_v50, 0 }
0x1461   :  { %v6510_v52 = vand.u32 4294901760, %v6441_v51 }
0x1463   :  { %v6511_v53 = vsub.f32 %v6441_v51, %v6510_v52 }
0x1465   :  { %v6512_v55 = vand.u32 4294901760, %v6511_v53 }
0x1467   :  { %v6513_v57 = vsub.f32 %v6511_v53, %v6512_v55 }
0x1469   :  { %v6514_v59 = vand.u32 4294901760, %v6513_v57 }
0x146b   :  { %9526 = vmatmul.mubr.f32.vlgmr.msra.gmra.mrb[10].mxu1 %v6514_v59 }
0x146c   :  { %10036 = vmatpush3.bf16.msra.mxu1 %v11254_v60  ;;  %9532 = vmatprep.mubr.msk.f32.mxu1 %vm10639_vm2, %v10640_v45 }
0x146d   :  { %10037 = vmatprep.subr.bf16.mxu1 %v10638_v32 }
0x1473   :  { %9533 = vmatmul.mubr.f32.vlgmr.msra.gmra.mrb[10].mxu1 %v6510_v52 }
0x1474   :  { %10039 = vmatpush3.bf16.msra.mxu1 %v11261_v62  ;;  %9539 = vmatprep.mubr.msk.f32.mxu1 %vm10639_vm2, %v10640_v45 }
0x1475   :  { %10040 = vmatprep.subr.bf16.mxu1 %v10638_v32 }
0x147b   :  { %9540 = vmatmul.mubr.f32.vlgmr.msra.gmra.mrb[10].mxu1 %v6511_v53 }
0x147c   :  { %10042 = vmatpush3.bf16.msra.mxu1 %v11235_v42  ;;  %9546 = vmatprep.mubr.msk.f32.mxu1 %vm10639_vm2, %v10640_v45 }
0x147d   :  { %10043 = vmatprep.subr.bf16.mxu1 %v10638_v32 }
0x1483   :  { %9547 = vmatmul.mubr.f32.vlgmr.msra.gmra.mrb[10].mxu1 %v6512_v55 }
0x1484   :  { %10045 = vmatpush3.bf16.msra.mxu1 %v11271_v63  ;;  %9553 = vmatprep.mubr.msk.f32.mxu1 %vm10639_vm2, %v10640_v45 }
0x1485   :  { %10046 = vmatprep.subr.bf16.mxu1 %v10638_v32 }
0x148b   :  { %9554 = vmatmul.mubr.f32.vlgmr.msra.gmra.mrb[10].mxu1 %v6510_v52 }
0x148c   :  { %10048 = vmatpush3.bf16.msra.mxu1 %v11235_v42  ;;  %9560 = vmatprep.mubr.msk.f32.mxu1 %vm10639_vm2, %v10640_v45 }
0x148d   :  { %10067 = vmatprep.subr.bf16.mxu1 %v10638_v32 }
0x1493   :  { %9561 = vmatmul.mubr.f32.vlgmr.msra.gmra.mrb[10].mxu1 %v6510_v52 }
0x1494   :  { %10069 = vmatpush3.bf16.msra.mxu1 %v11235_v42  ;;  %9609 = vmatprep.mubr.msk.f32.mxu1 %vm10639_vm2, %v10640_v45 }
0x1495   :  { %10070 = vmatprep.subr.bf16.mxu1 %v10638_v32 }
0x1566   :  { %v6898_v16 = vpop.f32.mrb[10].mxu1 }
0x1567   :  { %v6903_v17 = vrot.slane %v6898_v16, 3  ;;  %v6904_v5 = vrot.slane %v6898_v16, 4  ;;  %v9562_v1 = vpop.f32.mrb[11].mxu1 }
0x1569   :  { %v6907_v10 = vadd.f32 %v6903_v17, %v11291_v4  ;;  %v6908_v12 = vadd.f32 %v6904_v5, %v11294_v49 }
0x156b   :  { %10392 = vtanh.f32 %v6907_v10  ;;  %v8525_v23 = vmul.f32 -1.442695, %v6907_v10  ;;  %v8526_v24 = vmul.f32 -1.442695, %v6908_v12 }
0x156c   :  { %10394 = vtanh.f32 %v6908_v12 }
0x156d   :  { %10396 = vpow2.f32 %v8525_v23 }
0x156e   :  { %10398 = vpow2.f32 %v8526_v24 }
0x1575   :  { %v10393_v19 = vpop.eup %10392 }
0x1576   :  { %v10395_v21 = vpop.eup %10394  ;;  %6933 = vrot.lane.b32.xlu0 %v10393_v19, %s10641_s30 }
0x1577   :  { %6935 = vrot.lane.b32.xlu1 %v10395_v21, %s10641_s30  ;;  %v10397_v56 = vpop.eup %10396 }
0x1578   :  { %v10399_v54 = vpop.eup %10398  ;;  %v6915_v25 = vadd.f32 1.0, %v10397_v56 }
0x1579   :  { %v6916_v3 = vadd.f32 1.0, %v10399_v54 }
0x157a   :  { %10400 = vrcp.f32 %v6915_v25 }
0x157b   :  { %10402 = vrcp.f32 %v6916_v3 }
0x1584   :  { %v10401_v41 = vpop.eup %10400 }
0x1585   :  { %v10403_v13 = vpop.eup %10402  ;;  %v6929_v8 = vmul.f32 %v10401_v41, %v6925_v20 }
0x1586   :  { %v6930_v2 = vmul.f32 %v10403_v13, %v6926_v22 }
0x15e8   :  { %v6934_v11 = vpop.permute.xlu0 %6933 }
0x15e9   :  { %v6936_v7 = vpop.permute.xlu1 %6935  ;;  %v6939_v15 = vmul.f32 %v10401_v41, %v6934_v11 }
0x15ea   :  { %v6940_v18 = vmul.f32 %v10403_v13, %v6936_v7 }
0x15eb   :  { %6943 = vrot.lane.b32.xlu0 %v6939_v15, %s10642_s18 }
0x15ec   :  { %6945 = vrot.lane.b32.xlu1 %v6940_v18, %s10642_s18 }
0x165d   :  { %v6944_v26 = vpop.permute.xlu0 %6943 }
0x165e   :  { %v6946_v58 = vpop.permute.xlu1 %6945  ;;  %v11519_v27 = vadd.f32 %v6944_v26, %v6929_v8 }
0x165f   :  { %v11521_v28 = vadd.f32 %v6946_v58, %v6930_v2 }
0x1660   :  { %10404 = vtanh.f32 %v11519_v27  ;;  %v7454_v24 = vrot.slane %v11519_v27, 7 }
0x1661   :  { %10406 = vtanh.f32 %v11521_v28  ;;  %v7455_v56 = vrot.slane %v11521_v28, 7 }
0x166a   :  { %v10405_v38 = vpop.eup %10404 }
0x166b   :  { %v10407_v29 = vpop.eup %10406  ;;  %6955 = vrot.lane.b32.xlu0 %v10405_v38, %s10631_s7 }
0x166c   :  { %6957 = vrot.lane.b32.xlu1 %v10407_v29, %s10631_s7 }
0x16dd   :  { %v6956_v6 = vpop.permute.xlu0 %6955 }
0x16de   :  { %v6958_v30 = vpop.permute.xlu1 %6957  ;;  %v6961_v31 = vmul.f32 %v10401_v41, %v6956_v6 }
0x16df   :  { %v6962_v33 = vmul.f32 %v10403_v13, %v6958_v30 }
0x16e0   :  { %v6965_v34 = vrot.slane %v6961_v31, 5 }
0x16e1   :  { %v6966_v35 = vrot.slane %v6962_v33, 4 }
0x16e3   :  { %v6967_v36 = vsel %vm1835_vm1, %v6966_v35, %v6965_v34 }
0x16e4   :  { %6968 = vrot.lane.b32.xlu0 %v6967_v36, %s10643_s13 }
0x1756   :  { %v6969_v37 = vpop.permute.xlu0 %6968 }
0x1757   :  { %v6970_v39 = vsel %vm2828_vm4, %v6969_v37, 0 }
0x1758   :  { %v7039_v40 = vand.u32 4294901760, %v6970_v39 }
0x175a   :  { %v7040_v44 = vsub.f32 %v6970_v39, %v7039_v40 }
0x175c   :  { %v7041_v43 = vand.u32 4294901760, %v7040_v44 }
0x175e   :  { %v7042_v46 = vsub.f32 %v7040_v44, %v7041_v43 }
0x1760   :  { %v7043_v47 = vand.u32 4294901760, %v7042_v46 }
0x1762   :  { %9568 = vmatmul.mubr.f32.vlgmr.msra.gmra.mrb[12].mxu0 %v7043_v47 }
0x1763   :  { %10054 = vmatpush3.bf16.msra.mxu0 %v11254_v60  ;;  %9574 = vmatprep.mubr.msk.f32.mxu0 %vm10639_vm2, %v10640_v45 }
0x1764   :  { %10055 = vmatprep.subr.bf16.mxu0 %v10638_v32 }
0x176a   :  { %9575 = vmatmul.mubr.f32.vlgmr.msra.gmra.mrb[12].mxu0 %v7039_v40 }
0x176b   :  { %10057 = vmatpush3.bf16.msra.mxu0 %v11261_v62  ;;  %9581 = vmatprep.mubr.msk.f32.mxu0 %vm10639_vm2, %v10640_v45 }
0x176c   :  { %10058 = vmatprep.subr.bf16.mxu0 %v10638_v32 }
0x1772   :  { %9582 = vmatmul.mubr.f32.vlgmr.msra.gmra.mrb[12].mxu0 %v7040_v44 }
0x1773   :  { %10060 = vmatpush3.bf16.msra.mxu0 %v11235_v42  ;;  %9588 = vmatprep.mubr.msk.f32.mxu0 %vm10639_vm2, %v10640_v45 }
0x1774   :  { %10061 = vmatprep.subr.bf16.mxu0 %v10638_v32 }
0x177a   :  { %9589 = vmatmul.mubr.f32.vlgmr.msra.gmra.mrb[12].mxu0 %v7041_v43 }
0x177b   :  { %10063 = vmatpush3.bf16.msra.mxu0 %v11271_v63  ;;  %9595 = vmatprep.mubr.msk.f32.mxu0 %vm10639_vm2, %v10640_v45 }
0x177c   :  { %10064 = vmatprep.subr.bf16.mxu0 %v10638_v32 }
0x1782   :  { %9596 = vmatmul.mubr.f32.vlgmr.msra.gmra.mrb[12].mxu0 %v7039_v40 }
0x1783   :  { %10066 = vmatpush3.bf16.msra.mxu0 %v11235_v42  ;;  %9602 = vmatprep.mubr.msk.f32.mxu0 %vm10639_vm2, %v10640_v45 }
0x178a   :  { %9603 = vmatmul.mubr.f32.vlgmr.msra.gmra.mrb[12].mxu0 %v7039_v40 }
0x185d   :  { %v7427_v9 = vpop.f32.mrb[12].mxu0 }
0x185e   :  { %v7432_v14 = vrot.slane %v7427_v9, 2  ;;  %v7433_v48 = vrot.slane %v7427_v9, 3  ;;  %v9604_v61 = vpop.f32.mrb[13].mxu0 }
0x1860   :  { %v7436_v50 = vadd.f32 %v7432_v14, %v11291_v4  ;;  %v7437_v51 = vadd.f32 %v7433_v48, %v11294_v49 }
0x1862   :  { %10408 = vtanh.f32 %v7436_v50  ;;  %v8527_v55 = vmul.f32 -1.442695, %v7436_v50  ;;  %v8528_v57 = vmul.f32 -1.442695, %v7437_v51 }
0x1863   :  { %10410 = vtanh.f32 %v7437_v51 }
0x1864   :  { %10412 = vpow2.f32 %v8527_v55 }
0x1865   :  { %10414 = vpow2.f32 %v8528_v57 }
0x186c   :  { %v10409_v52 = vpop.eup %10408 }
0x186d   :  { %v10411_v53 = vpop.eup %10410  ;;  %7462 = vrot.lane.b32.xlu1 %v10409_v52, %s10641_s30 }
0x186e   :  { %7464 = vrot.lane.b32.xlu0 %v10411_v53, %s10641_s30  ;;  %v10413_v59 = vpop.eup %10412 }
0x186f   :  { %v10415_v16 = vpop.eup %10414  ;;  %v7444_v17 = vadd.f32 1.0, %v10413_v59 }
0x1870   :  { %v7445_v5 = vadd.f32 1.0, %v10415_v16 }
0x1871   :  { %10416 = vrcp.f32 %v7444_v17 }
0x1872   :  { %10418 = vrcp.f32 %v7445_v5  ;;  %v8021_v5 = vld [vmem:[%s11652_s12] sm:$0xff] }
0x187b   :  { %v10417_v1 = vpop.eup %10416 }
0x187c   :  { %v10419_v12 = vpop.eup %10418  ;;  %v7458_v54 = vmul.f32 %v10417_v1, %v7454_v24 }
0x187d   :  { %v7459_v25 = vmul.f32 %v10419_v12, %v7455_v56 }
0x18df   :  { %v7463_v10 = vpop.permute.xlu1 %7462 }
0x18e0   :  { %v7465_v19 = vpop.permute.xlu0 %7464  ;;  %v7468_v21 = vmul.f32 %v10417_v1, %v7463_v10  ;;  %v8033_v10 = vand.u32 4294901760, %v8021_v5 }
0x18e1   :  { %v7469_v23 = vmul.f32 %v10419_v12, %v7465_v19 }
0x18e2   :  { %7472 = vrot.lane.b32.xlu1 %v7468_v21, %s10642_s18 }
0x18e3   :  { %7474 = vrot.lane.b32.xlu0 %v7469_v23, %s10642_s18  ;;  %v8111_v23 = vsub.f32 %v8021_v5, %v8033_v10 }
0x1954   :  { %v7473_v3 = vpop.permute.xlu1 %7472 }
0x1955   :  { %v7475_v41 = vpop.permute.xlu0 %7474  ;;  %v11557_v11 = vadd.f32 %v7473_v3, %v7458_v54  ;;  %v8112_v3 = vand.u32 4294901760, %v8111_v23 }
0x1956   :  { %v11559_v13 = vadd.f32 %v7475_v41, %v7459_v25 }
0x1957   :  { %10420 = vtanh.f32 %v11557_v11  ;;  %v7983_v61 = vrot.slane %v11557_v11, 7 }
0x1958   :  { %10422 = vtanh.f32 %v11559_v13  ;;  %v7984_v50 = vrot.slane %v11559_v13, 7 }
0x1961   :  { %v10421_v7 = vpop.eup %10420 }
0x1962   :  { %v10423_v15 = vpop.eup %10422  ;;  %7484 = vrot.lane.b32.xlu1 %v10421_v7, %s10631_s7  ;;  %v8113_v7 = vsub.f32 %v8111_v23, %v8112_v3 }
0x1963   :  { %7486 = vrot.lane.b32.xlu0 %v10423_v15, %s10631_s7 }
0x19d4   :  { %v7485_v18 = vpop.permute.xlu1 %7484 }
0x19d5   :  { %v7487_v20 = vpop.permute.xlu0 %7486  ;;  %v7490_v22 = vmul.f32 %v10417_v1, %v7485_v18  ;;  %v8022_v1 = vld [vmem:[%s11652_s12 + $0x8] sm:$0xff] }
0x19d6   :  { %v7491_v8 = vmul.f32 %v10419_v12, %v7487_v20  ;;  %v8036_v12 = vand.u32 4294901760, %v8022_v1  ;;  %v8114_v20 = vand.u32 4294901760, %v8113_v7 }
0x19d7   :  { %v7494_v2 = vrot.slane %v7490_v22, 6 }
0x19d8   :  { %v7495_v26 = vrot.slane %v7491_v8, 5  ;;  %v10086_v21 = vpack.c.bf16 %v8036_v12, %v8033_v10  ;;  %v8118_v24 = vsub.f32 %v8022_v1, %v8036_v12 }
0x19da   :  { %v7496_v58 = vsel %vm1835_vm1, %v7495_v26, %v7494_v2  ;;  %v8119_v41 = vand.u32 4294901760, %v8118_v24  ;;  %v10092_v2 = vpack.c.bf16 %v8118_v24, %v8111_v23 }
0x19db   :  { %7497 = vrot.lane.b32.xlu1 %v7496_v58, %s10643_s13 }
0x19dc   :  { %v8120_v15 = vsub.f32 %v8118_v24, %v8119_v41  ;;  %v10098_v26 = vpack.c.bf16 %v8119_v41, %v8112_v3 }
0x19de   :  { %v8121_v22 = vand.u32 4294901760, %v8120_v15 }
0x19e0   :  { %v10089_v8 = vpack.c.bf16 %v8121_v22, %v8114_v20 }
0x1a4d   :  { %v7498_v27 = vpop.permute.xlu1 %7497 }
0x1a4e   :  { %v7499_v28 = vsel %vm2828_vm4, %v7498_v27, 0 }
0x1a4f   :  { %v7568_v38 = vand.u32 4294901760, %v7499_v28 }
0x1a51   :  { %v7569_v29 = vsub.f32 %v7499_v28, %v7568_v38 }
0x1a53   :  { %v7570_v6 = vand.u32 4294901760, %v7569_v29 }
0x1a55   :  { %v7571_v30 = vsub.f32 %v7569_v29, %v7570_v6 }
0x1a57   :  { %v7572_v31 = vand.u32 4294901760, %v7571_v30 }
0x1a59   :  { %9610 = vmatmul.mubr.f32.vlgmr.msra.gmra.mrb[12].mxu1 %v7572_v31  ;;  %v8514_v31 = vld [vmem:[%s11654_s14] ss:$0 sm:$0xff] }
0x1a5a   :  { %10072 = vmatpush3.bf16.msra.mxu1 %v11254_v60  ;;  %9616 = vmatprep.mubr.msk.f32.mxu1 %vm10639_vm2, %v10640_v45 }
0x1a5b   :  { %10073 = vmatprep.subr.bf16.mxu1 %v10638_v32 }
0x1a61   :  { %9617 = vmatmul.mubr.f32.vlgmr.msra.gmra.mrb[12].mxu1 %v7568_v38 }
0x1a62   :  { %10075 = vmatpush3.bf16.msra.mxu1 %v11261_v62  ;;  %9623 = vmatprep.mubr.msk.f32.mxu1 %vm10639_vm2, %v10640_v45 }
0x1a63   :  { %10076 = vmatprep.subr.bf16.mxu1 %v10638_v32 }
0x1a69   :  { %9624 = vmatmul.mubr.f32.vlgmr.msra.gmra.mrb[12].mxu1 %v7569_v29 }
0x1a6a   :  { %10078 = vmatpush3.bf16.msra.mxu1 %v11235_v42  ;;  %9630 = vmatprep.mubr.msk.f32.mxu1 %vm10639_vm2, %v10640_v45 }
0x1a6b   :  { %10079 = vmatprep.subr.bf16.mxu1 %v10638_v32 }
0x1a71   :  { %9631 = vmatmul.mubr.f32.vlgmr.msra.gmra.mrb[12].mxu1 %v7570_v6 }
0x1a72   :  { %10081 = vmatpush3.bf16.msra.mxu1 %v11271_v63  ;;  %9637 = vmatprep.mubr.msk.f32.mxu1 %vm10639_vm2, %v10640_v45 }
0x1a73   :  { %10082 = vmatprep.subr.bf16.mxu1 %v10638_v32 }
0x1a79   :  { %9638 = vmatmul.mubr.f32.vlgmr.msra.gmra.mrb[12].mxu1 %v7568_v38 }
0x1a7a   :  { %10084 = vmatpush3.bf16.msra.mxu1 %v11235_v42  ;;  %9644 = vmatprep.mubr.msk.f32.mxu1 %vm10639_vm2, %v10640_v45 }
0x1a7b   :  { %10085 = vmatprep.subr.bf16.mxu1 %v10638_v32 }
0x1a81   :  { %9645 = vmatmul.mubr.f32.vlgmr.msra.gmra.mrb[12].mxu1 %v7568_v38 }
0x1a82   :  { %9651 = vmatprep.mubr.msk.f32.mxu1 %vm10639_vm2, %v10640_v45  ;;  %10087 = vmatpush3.bf16.msra.mxu1 %v10086_v21 }
0x1a83   :  { %10088 = vmatprep.subr.bf16.mxu1 %v10638_v32 }
0x1b54   :  { %v7956_v60 = vpop.f32.mrb[12].mxu1 }
0x1b55   :  { %v7961_v62 = vrot.slane %v7956_v60, 1  ;;  %v7962_v63 = vrot.slane %v7956_v60, 2  ;;  %v9646_v33 = vpop.f32.mrb[13].mxu1  ;;  %v3408_v60 = vadd.f32 %v8514_v31, %v11285_v0 }
0x1b57   :  { %v7965_v34 = vadd.f32 %v7961_v62, %v11291_v4  ;;  %v7966_v35 = vadd.f32 %v7962_v63, %v11294_v49 }
0x1b59   :  { %10424 = vtanh.f32 %v7965_v34  ;;  %v8529_v37 = vmul.f32 -1.442695, %v7965_v34  ;;  %v8530_v39 = vmul.f32 -1.442695, %v7966_v35 }
0x1b5a   :  { %10426 = vtanh.f32 %v7966_v35 }
0x1b5b   :  { %10428 = vpow2.f32 %v8529_v37 }
0x1b5c   :  { %10430 = vpow2.f32 %v8530_v39 }
0x1b63   :  { %v10425_v42 = vpop.eup %10424 }
0x1b64   :  { %v10427_v36 = vpop.eup %10426  ;;  %7991 = vrot.lane.b32.xlu0 %v10425_v42, %s10641_s30 }
0x1b65   :  { %7993 = vrot.lane.b32.xlu1 %v10427_v36, %s10641_s30  ;;  %v10429_v40 = vpop.eup %10428 }
0x1b66   :  { %v10431_v44 = vpop.eup %10430  ;;  %v7973_v43 = vadd.f32 1.0, %v10429_v40 }
0x1b67   :  { %v7974_v46 = vadd.f32 1.0, %v10431_v44 }
0x1b68   :  { %10432 = vrcp.f32 %v7973_v43 }
0x1b69   :  { %10434 = vrcp.f32 %v7974_v46 }
0x1b72   :  { %v10433_v4 = vpop.eup %10432 }
0x1b73   :  { %v10435_v47 = vpop.eup %10434  ;;  %v7987_v51 = vmul.f32 %v10433_v4, %v7983_v61 }
0x1b74   :  { %v7988_v52 = vmul.f32 %v10435_v47, %v7984_v50 }
0x1bd6   :  { %v7992_v49 = vpop.permute.xlu0 %7991 }
0x1bd7   :  { %v7994_v9 = vpop.permute.xlu1 %7993  ;;  %v7997_v14 = vmul.f32 %v10433_v4, %v7992_v49 }
0x1bd8   :  { %v7998_v48 = vmul.f32 %v10435_v47, %v7994_v9 }
0x1bd9   :  { %8001 = vrot.lane.b32.xlu0 %v7997_v14, %s10642_s18 }
0x1bda   :  { %8003 = vrot.lane.b32.xlu1 %v7998_v48, %s10642_s18 }
0x1c4b   :  { %v8002_v53 = vpop.permute.xlu0 %8001 }
0x1c4c   :  { %v8004_v55 = vpop.permute.xlu1 %8003  ;;  %v8007_v57 = vadd.f32 %v8002_v53, %v7987_v51 }
0x1c4d   :  { %v8008_v59 = vadd.f32 %v8004_v55, %v7988_v52 }
0x1c4e   :  { %10436 = vtanh.f32 %v8007_v57 }
0x1c4f   :  { %10438 = vtanh.f32 %v8008_v59 }
0x1c58   :  { %v10437_v16 = vpop.eup %10436 }
0x1c59   :  { %v10439_v17 = vpop.eup %10438  ;;  %8013 = vrot.lane.b32.xlu0 %v10437_v16, %s10631_s7 }
0x1c5a   :  { %8015 = vrot.lane.b32.xlu1 %v10439_v17, %s10631_s7 }
0x1ccb   :  { %v8014_v19 = vpop.permute.xlu0 %8013 }
0x1ccc   :  { %v8016_v56 = vpop.permute.xlu1 %8015  ;;  %v8019_v54 = vmul.f32 %v10433_v4, %v8014_v19 }
0x1ccd   :  { %v8020_v25 = vmul.f32 %v10435_v47, %v8016_v56 }
0x1cce   :  { %v8025_v11 = vrot.slane %v8019_v54, 7 }
0x1ccf   :  { %v8026_v13 = vrot.slane %v8020_v25, 6 }
0x1cd1   :  { %v8027_v18 = vsel %vm1835_vm1, %v8026_v13, %v8025_v11 }
0x1cd2   :  { %8028 = vrot.lane.b32.xlu0 %v8027_v18, %s10643_s13 }
0x1d44   :  { %v8029_v58 = vpop.permute.xlu0 %8028 }
0x1d45   :  { %v8030_v27 = vsel %vm2828_vm4, %v8029_v58, 0 }
0x1d46   :  { %v8099_v28 = vand.u32 4294901760, %v8030_v27 }
0x1d48   :  { %v8100_v38 = vsub.f32 %v8030_v27, %v8099_v28 }
0x1d4a   :  { %v8101_v29 = vand.u32 4294901760, %v8100_v38 }
0x1d4c   :  { %v8102_v6 = vsub.f32 %v8100_v38, %v8101_v29 }
0x1d4e   :  { %v8103_v30 = vand.u32 4294901760, %v8102_v6 }
0x1d50   :  { %9652 = vmatmul.mubr.f32.vlgmr.msra.gmra.mrb[2].mxu1 %v8103_v30 }
0x1d51   :  { %10090 = vmatpush3.bf16.msra.mxu1 %v10089_v8  ;;  %9658 = vmatprep.mubr.msk.f32.mxu1 %vm10639_vm2, %v10640_v45 }
0x1d52   :  { %10091 = vmatprep.subr.bf16.mxu1 %v10638_v32 }
0x1d58   :  { %9659 = vmatmul.mubr.f32.vlgmr.msra.gmra.mrb[2].mxu1 %v8099_v28 }
0x1d59   :  { %10093 = vmatpush3.bf16.msra.mxu1 %v10092_v2  ;;  %9665 = vmatprep.mubr.msk.f32.mxu1 %vm10639_vm2, %v10640_v45 }
0x1d5a   :  { %10094 = vmatprep.subr.bf16.mxu1 %v10638_v32 }
0x1d60   :  { %9666 = vmatmul.mubr.f32.vlgmr.msra.gmra.mrb[2].mxu1 %v8100_v38 }
0x1d61   :  { %10096 = vmatpush3.bf16.msra.mxu1 %v10086_v21  ;;  %9672 = vmatprep.mubr.msk.f32.mxu1 %vm10639_vm2, %v10640_v45 }
0x1d62   :  { %10097 = vmatprep.subr.bf16.mxu1 %v10638_v32 }
0x1d68   :  { %9673 = vmatmul.mubr.f32.vlgmr.msra.gmra.mrb[2].mxu1 %v8101_v29 }
0x1d69   :  { %10099 = vmatpush3.bf16.msra.mxu1 %v10098_v26  ;;  %9679 = vmatprep.mubr.msk.f32.mxu1 %vm10639_vm2, %v10640_v45 }
0x1d6a   :  { %10100 = vmatprep.subr.bf16.mxu1 %v10638_v32 }
0x1d70   :  { %9680 = vmatmul.mubr.f32.vlgmr.msra.gmra.mrb[2].mxu1 %v8099_v28 }
0x1d71   :  { %10102 = vmatpush3.bf16.msra.mxu1 %v10086_v21  ;;  %9686 = vmatprep.mubr.msk.f32.mxu1 %vm10639_vm2, %v10640_v45 }
0x1d78   :  { %9687 = vmatmul.mubr.f32.vlgmr.msra.gmra.mrb[2].mxu1 %v8099_v28 }
0x1e4b   :  { %v8487_v62 = vpop.f32.mrb[2].mxu1 }
0x1e4c   :  { %v10107_v63 = vadd.f32 %v8487_v62, %v3408_v60  ;;  %v9688_v33 = vpop.f32.mrb[3].mxu1 }
0x1e4e   :  { %8492 = vst [vmem:[#allocation14] sm:$0x3] %v10107_v63 }
0x1e4f   :  { %10605 = shalt.err (!%p10602_p4)
}
0x1e50   :  { %s10606_s14 = scalar_lea.hbm %s11655_s15, 32 }
0x1e51   :  { %p10607_p5 = scmp.ne.s32.totalorder %s11655_s15, %s10606_s14  ;;  %p10610_p6 = scmp.lt.u32.totalorder %s10606_s14, %s11655_s15 }
0x1e53   :  { %p10612_p7 = pnand %p10610_p6, %p10607_p5 }
0x1e55   :  { %10615 = shalt.err (!%p10612_p7)
}
0x1e56   :  { %8502 = dma.vmem_to_hbm [thread:$0]  %s8500_s3, 32, %s11655_s15, [#allocation4]  }
0x1e57   :  { %10624 = dma.done.wait [#allocation4], 32  }
0x1e58   :  { %10625 = vsyncadd [#allocation4], 4294967264 }
0x1e59   :  { %8506 = vsyncpa [#allocation3], 1 }
0x1e5a   :  { %8507 = vsyncpa [#allocation6], 1 }
0x1e5b   :  { %8508 = vsyncpa [#allocation9], 1 }
0x1e5c   :  { %8509 = vsyncpa [#allocation12], 1 }
0x1e5d   :  { %8510 = vsyncpa [#allocation4], 1 }

</bundles_post_ra>
